<compile_context>
chip_gen: v7x
topology: tpu7x:2x2x1
jax: 0.10.0
libtpu: 0.0.40
codegen_flags: <defaults>
</compile_context>

<pallas_src>
import functools

import jax
import jax.numpy as jnp
from jax.experimental import pallas as pl
from jax.experimental.pallas import tpu as pltpu


# ----------------------------------------------------------------------------
# Tile-size helper: largest multiple-of-8 divisor of M <= cap (else full M).
# ----------------------------------------------------------------------------
def _pick_tm(M, cap=512):
    if M <= cap:
        return M
    for tm in range(cap - cap % 8, 7, -8):
        if M % tm == 0:
            return tm
    return M


# ----------------------------------------------------------------------------
# Pallas kernel 1: fused  y = relu?(x @ w + b)   (bf16 MXU, f32 accumulate)
# ----------------------------------------------------------------------------
def _linear_kernel(x_ref, w_ref, b_ref, o_ref, *, relu):
    x = x_ref[...].astype(jnp.bfloat16)
    acc = jnp.dot(x, w_ref[...], preferred_element_type=jnp.float32)
    acc = acc + b_ref[...]                    # (1, N) broadcasts over rows
    if relu:
        acc = jnp.maximum(acc, 0.0)
    o_ref[...] = acc.astype(o_ref.dtype)


def pallas_linear(x, w_bf16, b_1n, relu=False, tm_cap=512):
    """x:(M,K) bf16/f32, w:(K,N) bf16, b:(1,N) f32 -> (M,N) f32. M-tiled grid."""
    M, K = x.shape
    K2, N = w_bf16.shape
    assert K == K2, (K, K2)
    TM = _pick_tm(M, tm_cap)
    grid_m = M // TM
    cost = pl.CostEstimate(
        flops=2 * M * K * N,
        transcendentals=0,
        bytes_accessed=M * K * x.dtype.itemsize + K * N * 2 + N * 4 + M * N * 4,
    )
    return pl.pallas_call(
        functools.partial(_linear_kernel, relu=relu),
        out_shape=jax.ShapeDtypeStruct((M, N), jnp.float32),
        grid=(grid_m,),
        in_specs=[
            pl.BlockSpec((TM, K), lambda i: (i, 0)),
            pl.BlockSpec((K, N), lambda i: (0, 0)),
            pl.BlockSpec((1, N), lambda i: (0, 0)),
        ],
        out_specs=pl.BlockSpec((TM, N), lambda i: (i, 0)),
        compiler_params=pltpu.CompilerParams(dimension_semantics=("parallel",)),
        cost_estimate=cost,
    )(x, w_bf16, b_1n)


# ----------------------------------------------------------------------------
# Pallas kernel 2: fused  mu = (relu(h @ w_fc + b_fc)) @ w_mu + b_mu
# (reads h once, keeps the 256-wide hidden entirely in VMEM, writes only mu)
# ----------------------------------------------------------------------------
def _fc_mu_kernel(h_ref, wf_ref, bf_ref, wm_ref, bm_ref, o_ref):
    h = h_ref[...].astype(jnp.bfloat16)
    t = jnp.dot(h, wf_ref[...], preferred_element_type=jnp.float32) + bf_ref[...]
    t = jnp.maximum(t, 0.0).astype(jnp.bfloat16)
    mu = jnp.dot(t, wm_ref[...], preferred_element_type=jnp.float32) + bm_ref[...]
    o_ref[...] = mu.astype(o_ref.dtype)


def pallas_fc_mu(h, w_fc, b_fc, w_mu, b_mu, tm_cap=512):
    """h:(M,K) bf16/f32, w_fc:(K,H) bf16, w_mu:(H,Z) bf16 -> (M,Z) f32."""
    M, K = h.shape
    K2, H = w_fc.shape
    H2, Z = w_mu.shape
    assert K == K2 and H == H2, (K, K2, H, H2)
    TM = _pick_tm(M, tm_cap)
    grid_m = M // TM
    cost = pl.CostEstimate(
        flops=2 * M * K * H + 2 * M * H * Z,
        transcendentals=0,
        bytes_accessed=M * K * h.dtype.itemsize + K * H * 2 + H * Z * 2 + M * Z * 4,
    )
    return pl.pallas_call(
        _fc_mu_kernel,
        out_shape=jax.ShapeDtypeStruct((M, Z), jnp.float32),
        grid=(grid_m,),
        in_specs=[
            pl.BlockSpec((TM, K), lambda i: (i, 0)),
            pl.BlockSpec((K, H), lambda i: (0, 0)),
            pl.BlockSpec((1, H), lambda i: (0, 0)),
            pl.BlockSpec((H, Z), lambda i: (0, 0)),
            pl.BlockSpec((1, Z), lambda i: (0, 0)),
        ],
        out_specs=pl.BlockSpec((TM, Z), lambda i: (i, 0)),
        compiler_params=pltpu.CompilerParams(dimension_semantics=("parallel",)),
        cost_estimate=cost,
    )(h, w_fc, b_fc, w_mu, b_mu)


# ----------------------------------------------------------------------------
# im2col on NHWC activations (XLA glue; feature order = (ki, kj, c))
# ----------------------------------------------------------------------------
def _im2col_nhwc(x, kh, kw, stride, padding):
    N, H, W, C = x.shape
    xp = jnp.pad(x, ((0, 0), (padding, padding), (padding, padding), (0, 0)))
    Ho = (H + 2 * padding - kh) // stride + 1
    Wo = (W + 2 * padding - kw) // stride + 1
    slices = []
    for ki in range(kh):
        for kj in range(kw):
            slices.append(
                xp[:, ki:ki + stride * Ho:stride, kj:kj + stride * Wo:stride, :]
            )  # (N, Ho, Wo, C)
    cols = jnp.stack(slices, axis=3)                 # (N, Ho, Wo, kh*kw, C)
    return cols.reshape(N * Ho * Wo, kh * kw * C), Ho, Wo


# ----------------------------------------------------------------------------
# Parameter init (PyTorch layouts) + one-time packing into kernel layouts
# ----------------------------------------------------------------------------
def _uniform(key, shape, fan_in):
    bound = 1.0 / jnp.sqrt(jnp.float32(fan_in))
    return jax.random.uniform(key, shape, jnp.float32, -bound, bound)


def init_vae_params(key, in_features, z_dim, h_dim=256):
    ks = jax.random.split(key, 8)
    p = {}
    # Encoder28 (assumed, see TODO at top): 28 -> 14 -> 7 -> h_dim
    p["conv1_w"] = _uniform(ks[0], (32, in_features, 4, 4), in_features * 16)
    p["conv1_b"] = _uniform(ks[1], (32,), in_features * 16)
    p["conv2_w"] = _uniform(ks[2], (64, 32, 4, 4), 32 * 16)
    p["conv2_b"] = _uniform(ks[3], (64,), 32 * 16)
    p["fc_w"] = _uniform(ks[4], (h_dim, 64 * 7 * 7), 64 * 7 * 7)  # PyTorch (out,in)
    p["fc_b"] = _uniform(ks[5], (h_dim,), 64 * 7 * 7)
    p["mu_w"] = _uniform(ks[6], (z_dim, h_dim), h_dim)            # PyTorch (out,in)
    p["mu_b"] = _uniform(ks[7], (z_dim,), h_dim)
    return p


def pack_params(p, h_dim=256):
    """One-time (off-hot-path) layout + dtype transforms of PyTorch weights."""
    q = {}
    # conv: (O, C, kh, kw) -> (kh, kw, C, O) -> (kh*kw*C, O), matches im2col order
    for name, tag in (("conv1", "1"), ("conv2", "2")):
        w = p[name + "_w"]
        O, C, kh, kw = w.shape
        q["w" + tag] = (
            w.transpose(2, 3, 1, 0).reshape(kh * kw * C, O).astype(jnp.bfloat16)
        )
        q["b" + tag] = p[name + "_b"].reshape(1, O).astype(jnp.float32)
    # fc: PyTorch rows index NCHW-flattened (c, h, w); our activations flatten
    # NHWC (h, w, c) -> permute columns once, then pre-transpose to (in, out).
    fc = p["fc_w"].reshape(h_dim, 64, 7, 7).transpose(0, 2, 3, 1).reshape(h_dim, 7 * 7 * 64)
    q["w_fc"] = fc.T.astype(jnp.bfloat16)                     # (3136, 256)
    q["b_fc"] = p["fc_b"].reshape(1, h_dim).astype(jnp.float32)
    q["w_mu"] = p["mu_w"].T.astype(jnp.bfloat16)              # (256, z_dim)
    q["b_mu"] = p["mu_b"].reshape(1, -1).astype(jnp.float32)
    return q


# ----------------------------------------------------------------------------
# VAE.forward(x):  h = encoder(x);  return mu(h)
# ----------------------------------------------------------------------------
def vae_forward(packed, x_nchw):
    x = jnp.transpose(x_nchw, (0, 2, 3, 1)).astype(jnp.float32)   # one-time NCHW->NHWC
    N = x.shape[0]
    cols1, ho1, wo1 = _im2col_nhwc(x, 4, 4, 2, 1)                 # (N*14*14, C*16)
    cols1 = cols1.astype(jnp.bfloat16)                            # half HBM bytes in
    h1 = pallas_linear(cols1, packed["w1"], packed["b1"], relu=True)   # (N*196, 32)
    h1 = h1.reshape(N, ho1, wo1, 32)                              # NHWC, plain reshape
    cols2, ho2, wo2 = _im2col_nhwc(h1, 4, 4, 2, 1)                # (N*49, 512)
    cols2 = cols2.astype(jnp.bfloat16)
    h2 = pallas_linear(cols2, packed["w2"], packed["b2"], relu=True)   # (N*49, 64)
    h2 = h2.reshape(N, ho2 * wo2 * 64).astype(jnp.bfloat16)       # (N, 3136) NHWC flatten
    mu = pallas_fc_mu(h2, packed["w_fc"], packed["b_fc"],
                      packed["w_mu"], packed["b_mu"])             # (N, z_dim)
    return mu


if __name__ == "__main__":
    key = jax.random.PRNGKey(0)
    k_param, k_x = jax.random.split(key)

    in_features, z_dim, resolution, batch = 4, 32, 28, 2
    params = init_vae_params(k_param, in_features, z_dim, h_dim=256)
    packed = pack_params(params, h_dim=256)

    x = jax.random.uniform(
        k_x, (batch, in_features, resolution, resolution), dtype=jnp.float32
    )

    fwd = jax.jit(vae_forward)
    mu = fwd(packed, x)
    mu = jax.block_until_ready(mu)
    assert mu.shape == (batch, z_dim), mu.shape
    assert bool(jnp.all(jnp.isfinite(mu)))
    print("KERNEL_OK")
</pallas_src>

<mosaic_0001>
module attributes {stable_mosaic.version = 11 : i64} {
  func.func @_linear_kernel(%arg0: i32, %arg1: memref<392x64xbf16, #tpu.memory_space<vmem>>, %arg2: memref<64x32xbf16, #tpu.memory_space<vmem>>, %arg3: memref<1x32xf32, #tpu.memory_space<vmem>>, %arg4: memref<392x32xf32, #tpu.memory_space<vmem>>) attributes {dimension_semantics = [#tpu.dimension_semantics<parallel>], iteration_bounds = array<i64: 1>, scalar_prefetch = 0 : i64, scratch_operands = 0 : i64, tpu.core_type = #tpu.core_type<tc>, window_params = [{transform_indices = @transform_0, window_bounds = array<i64: 392, 64>}, {pipeline_mode = #tpu.pipeline_mode<synchronous>, transform_indices = @transform_1, window_bounds = array<i64: 64, 32>}, {pipeline_mode = #tpu.pipeline_mode<synchronous>, transform_indices = @transform_2, window_bounds = array<i64: 1, 32>}, {transform_indices = @transform_3, window_bounds = array<i64: 392, 32>}]} {
    %c0 = arith.constant 0 : index
    %c0_0 = arith.constant 0 : index
    %0 = vector.load %arg1[%c0, %c0_0] : memref<392x64xbf16, #tpu.memory_space<vmem>>, vector<392x64xbf16>
    %c0_1 = arith.constant 0 : index
    %c0_2 = arith.constant 0 : index
    %1 = vector.load %arg2[%c0_1, %c0_2] : memref<64x32xbf16, #tpu.memory_space<vmem>>, vector<64x32xbf16>
    %cst = arith.constant dense<0.000000e+00> : vector<392x32xf32>
    %2 = tpu.matmul %0, %1, %cst {dimension_numbers = #tpu.dot_dimension_numbers<[1], [0], [0], [1], [0, 0, 1, 1], [], []>} : vector<392x64xbf16>, vector<64x32xbf16>, vector<392x32xf32> -> vector<392x32xf32>
    %c0_3 = arith.constant 0 : index
    %c0_4 = arith.constant 0 : index
    %3 = vector.load %arg3[%c0_3, %c0_4] : memref<1x32xf32, #tpu.memory_space<vmem>>, vector<1x32xf32>
    %4 = vector.broadcast %3 : vector<1x32xf32> to vector<392x32xf32>
    %5 = arith.addf %2, %4 : vector<392x32xf32>
    %cst_5 = arith.constant 0.000000e+00 : f32
    %6 = vector.broadcast %cst_5 : f32 to vector<392x32xf32>
    %7 = arith.maximumf %5, %6 : vector<392x32xf32>
    %c0_6 = arith.constant 0 : index
    %c0_7 = arith.constant 0 : index
    %8 = vector.load %arg4[%c0_6, %c0_7] : memref<392x32xf32, #tpu.memory_space<vmem>>, vector<392x32xf32>
    tpu.vector_store %arg4[%c0_6, %c0_7], %7 {strides = array<i32>} : memref<392x32xf32, #tpu.memory_space<vmem>>, vector<392x32xf32>,
    return
  }
  func.func @transform_0(%arg0: i32) -> (i32, i32) {
    %c0_i32 = arith.constant 0 : i32
    %c0_i32_0 = arith.constant 0 : i32
    return %arg0, %c0_i32 : i32, i32
  }
  func.func @transform_1(%arg0: i32) -> (i32, i32) {
    %c0_i32 = arith.constant 0 : i32
    %c0_i32_0 = arith.constant 0 : i32
    %c0_i32_1 = arith.constant 0 : i32
    return %c0_i32, %c0_i32_0 : i32, i32
  }
  func.func @transform_2(%arg0: i32) -> (i32, i32) {
    %c0_i32 = arith.constant 0 : i32
    %c0_i32_0 = arith.constant 0 : i32
    %c0_i32_1 = arith.constant 0 : i32
    return %c0_i32, %c0_i32_0 : i32, i32
  }
  func.func @transform_3(%arg0: i32) -> (i32, i32) {
    %c0_i32 = arith.constant 0 : i32
    %c0_i32_0 = arith.constant 0 : i32
    return %arg0, %c0_i32 : i32, i32
  }
}

module attributes {stable_mosaic.version = 11 : i64} {
  func.func @_linear_kernel(%arg0: i32, %arg1: memref<98x512xbf16, #tpu.memory_space<vmem>>, %arg2: memref<512x64xbf16, #tpu.memory_space<vmem>>, %arg3: memref<1x64xf32, #tpu.memory_space<vmem>>, %arg4: memref<98x64xf32, #tpu.memory_space<vmem>>) attributes {dimension_semantics = [#tpu.dimension_semantics<parallel>], iteration_bounds = array<i64: 1>, scalar_prefetch = 0 : i64, scratch_operands = 0 : i64, tpu.core_type = #tpu.core_type<tc>, window_params = [{transform_indices = @transform_0, window_bounds = array<i64: 98, 512>}, {pipeline_mode = #tpu.pipeline_mode<synchronous>, transform_indices = @transform_1, window_bounds = array<i64: 512, 64>}, {pipeline_mode = #tpu.pipeline_mode<synchronous>, transform_indices = @transform_2, window_bounds = array<i64: 1, 64>}, {transform_indices = @transform_3, window_bounds = array<i64: 98, 64>}]} {
    %c0 = arith.constant 0 : index
    %c0_0 = arith.constant 0 : index
    %0 = vector.load %arg1[%c0, %c0_0] : memref<98x512xbf16, #tpu.memory_space<vmem>>, vector<98x512xbf16>
    %c0_1 = arith.constant 0 : index
    %c0_2 = arith.constant 0 : index
    %1 = vector.load %arg2[%c0_1, %c0_2] : memref<512x64xbf16, #tpu.memory_space<vmem>>, vector<512x64xbf16>
    %cst = arith.constant dense<0.000000e+00> : vector<98x64xf32>
    %2 = tpu.matmul %0, %1, %cst {dimension_numbers = #tpu.dot_dimension_numbers<[1], [0], [0], [1], [0, 0, 1, 1], [], []>} : vector<98x512xbf16>, vector<512x64xbf16>, vector<98x64xf32> -> vector<98x64xf32>
    %c0_3 = arith.constant 0 : index
    %c0_4 = arith.constant 0 : index
    %3 = vector.load %arg3[%c0_3, %c0_4] : memref<1x64xf32, #tpu.memory_space<vmem>>, vector<1x64xf32>
    %4 = vector.broadcast %3 : vector<1x64xf32> to vector<98x64xf32>
    %5 = arith.addf %2, %4 : vector<98x64xf32>
    %cst_5 = arith.constant 0.000000e+00 : f32
    %6 = vector.broadcast %cst_5 : f32 to vector<98x64xf32>
    %7 = arith.maximumf %5, %6 : vector<98x64xf32>
    %c0_6 = arith.constant 0 : index
    %c0_7 = arith.constant 0 : index
    %8 = vector.load %arg4[%c0_6, %c0_7] : memref<98x64xf32, #tpu.memory_space<vmem>>, vector<98x64xf32>
    tpu.vector_store %arg4[%c0_6, %c0_7], %7 {strides = array<i32>} : memref<98x64xf32, #tpu.memory_space<vmem>>, vector<98x64xf32>,
    return
  }
  func.func @transform_0(%arg0: i32) -> (i32, i32) {
    %c0_i32 = arith.constant 0 : i32
    %c0_i32_0 = arith.constant 0 : i32
    return %arg0, %c0_i32 : i32, i32
  }
  func.func @transform_1(%arg0: i32) -> (i32, i32) {
    %c0_i32 = arith.constant 0 : i32
    %c0_i32_0 = arith.constant 0 : i32
    %c0_i32_1 = arith.constant 0 : i32
    return %c0_i32, %c0_i32_0 : i32, i32
  }
  func.func @transform_2(%arg0: i32) -> (i32, i32) {
    %c0_i32 = arith.constant 0 : i32
    %c0_i32_0 = arith.constant 0 : i32
    %c0_i32_1 = arith.constant 0 : i32
    return %c0_i32, %c0_i32_0 : i32, i32
  }
  func.func @transform_3(%arg0: i32) -> (i32, i32) {
    %c0_i32 = arith.constant 0 : i32
    %c0_i32_0 = arith.constant 0 : i32
    return %arg0, %c0_i32 : i32, i32
  }
}

module attributes {stable_mosaic.version = 11 : i64} {
  func.func @_fc_mu_kernel(%arg0: i32, %arg1: memref<2x3136xbf16, #tpu.memory_space<vmem>>, %arg2: memref<3136x256xbf16, #tpu.memory_space<vmem>>, %arg3: memref<1x256xf32, #tpu.memory_space<vmem>>, %arg4: memref<256x32xbf16, #tpu.memory_space<vmem>>, %arg5: memref<1x32xf32, #tpu.memory_space<vmem>>, %arg6: memref<2x32xf32, #tpu.memory_space<vmem>>) attributes {dimension_semantics = [#tpu.dimension_semantics<parallel>], iteration_bounds = array<i64: 1>, scalar_prefetch = 0 : i64, scratch_operands = 0 : i64, tpu.core_type = #tpu.core_type<tc>, window_params = [{transform_indices = @transform_0, window_bounds = array<i64: 2, 3136>}, {pipeline_mode = #tpu.pipeline_mode<synchronous>, transform_indices = @transform_1, window_bounds = array<i64: 3136, 256>}, {pipeline_mode = #tpu.pipeline_mode<synchronous>, transform_indices = @transform_2, window_bounds = array<i64: 1, 256>}, {pipeline_mode = #tpu.pipeline_mode<synchronous>, transform_indices = @transform_3, window_bounds = array<i64: 256, 32>}, {pipeline_mode = #tpu.pipeline_mode<synchronous>, transform_indices = @transform_4, window_bounds = array<i64: 1, 32>}, {transform_indices = @transform_5, window_bounds = array<i64: 2, 32>}]} {
    %c0 = arith.constant 0 : index
    %c0_0 = arith.constant 0 : index
    %0 = vector.load %arg1[%c0, %c0_0] : memref<2x3136xbf16, #tpu.memory_space<vmem>>, vector<2x3136xbf16>
    %c0_1 = arith.constant 0 : index
    %c0_2 = arith.constant 0 : index
    %1 = vector.load %arg2[%c0_1, %c0_2] : memref<3136x256xbf16, #tpu.memory_space<vmem>>, vector<3136x256xbf16>
    %cst = arith.constant dense<0.000000e+00> : vector<2x256xf32>
    %2 = tpu.matmul %0, %1, %cst {dimension_numbers = #tpu.dot_dimension_numbers<[1], [0], [0], [1], [0, 0, 1, 1], [], []>} : vector<2x3136xbf16>, vector<3136x256xbf16>, vector<2x256xf32> -> vector<2x256xf32>
    %c0_3 = arith.constant 0 : index
    %c0_4 = arith.constant 0 : index
    %3 = vector.load %arg3[%c0_3, %c0_4] : memref<1x256xf32, #tpu.memory_space<vmem>>, vector<1x256xf32>
    %4 = vector.broadcast %3 : vector<1x256xf32> to vector<2x256xf32>
    %5 = arith.addf %2, %4 : vector<2x256xf32>
    %cst_5 = arith.constant 0.000000e+00 : f32
    %6 = vector.broadcast %cst_5 : f32 to vector<2x256xf32>
    %7 = arith.maximumf %5, %6 : vector<2x256xf32>
    %8 = arith.truncf %7 : vector<2x256xf32> to vector<2x256xbf16>
    %c0_6 = arith.constant 0 : index
    %c0_7 = arith.constant 0 : index
    %9 = vector.load %arg4[%c0_6, %c0_7] : memref<256x32xbf16, #tpu.memory_space<vmem>>, vector<256x32xbf16>
    %cst_8 = arith.constant dense<0.000000e+00> : vector<2x32xf32>
    %10 = tpu.matmul %8, %9, %cst_8 {dimension_numbers = #tpu.dot_dimension_numbers<[1], [0], [0], [1], [0, 0, 1, 1], [], []>} : vector<2x256xbf16>, vector<256x32xbf16>, vector<2x32xf32> -> vector<2x32xf32>
    %c0_9 = arith.constant 0 : index
    %c0_10 = arith.constant 0 : index
    %11 = vector.load %arg5[%c0_9, %c0_10] : memref<1x32xf32, #tpu.memory_space<vmem>>, vector<1x32xf32>
    %12 = vector.broadcast %11 : vector<1x32xf32> to vector<2x32xf32>
    %13 = arith.addf %10, %12 : vector<2x32xf32>
    %c0_11 = arith.constant 0 : index
    %c0_12 = arith.constant 0 : index
    %14 = vector.load %arg6[%c0_11, %c0_12] : memref<2x32xf32, #tpu.memory_space<vmem>>, vector<2x32xf32>
    tpu.vector_store %arg6[%c0_11, %c0_12], %13 {strides = array<i32>} : memref<2x32xf32, #tpu.memory_space<vmem>>, vector<2x32xf32>,
    return
  }
  func.func @transform_0(%arg0: i32) -> (i32, i32) {
    %c0_i32 = arith.constant 0 : i32
    %c0_i32_0 = arith.constant 0 : i32
    return %arg0, %c0_i32 : i32, i32
  }
  func.func @transform_1(%arg0: i32) -> (i32, i32) {
    %c0_i32 = arith.constant 0 : i32
    %c0_i32_0 = arith.constant 0 : i32
    %c0_i32_1 = arith.constant 0 : i32
    return %c0_i32, %c0_i32_0 : i32, i32
  }
  func.func @transform_2(%arg0: i32) -> (i32, i32) {
    %c0_i32 = arith.constant 0 : i32
    %c0_i32_0 = arith.constant 0 : i32
    %c0_i32_1 = arith.constant 0 : i32
    return %c0_i32, %c0_i32_0 : i32, i32
  }
  func.func @transform_3(%arg0: i32) -> (i32, i32) {
    %c0_i32 = arith.constant 0 : i32
    %c0_i32_0 = arith.constant 0 : i32
    %c0_i32_1 = arith.constant 0 : i32
    return %c0_i32, %c0_i32_0 : i32, i32
  }
  func.func @transform_4(%arg0: i32) -> (i32, i32) {
    %c0_i32 = arith.constant 0 : i32
    %c0_i32_0 = arith.constant 0 : i32
    %c0_i32_1 = arith.constant 0 : i32
    return %c0_i32, %c0_i32_0 : i32, i32
  }
  func.func @transform_5(%arg0: i32) -> (i32, i32) {
    %c0_i32 = arith.constant 0 : i32
    %c0_i32_0 = arith.constant 0 : i32
    return %arg0, %c0_i32 : i32, i32
  }
}

</mosaic_0001>

<bundles_post_ra>
// kernel: vae_forward.3
= control target key start
LH: loop header
LB: loop body
LE: loop exit
PB: predicated region body
PF: predicated region fallthrough
CT: control target
= control target key end

     0   :  { %v868_v0 = vmov 0.0   ;;  %vm869_vm0 = vmmov 0   ;;  %vm226_vm1 = vcmask 523264   ;;  %vm583_vm2 = vcmask 261120   ;;  %s1310_s1 = inlined_call_operand.vmem [shape: bf16[64,32], index: 1, kind: input, shape index: {}]   ;;  %s1311_s0 = inlined_call_operand.vmem [shape: bf16[392,64], index: 0, kind: input, shape index: {}]   ;;  %s1312_s2 = inlined_call_operand.vmem [shape: f32[1,32], index: 2, kind: input, shape index: {}]   ;;  %s1313_s3 = inlined_call_operand.vmem [shape: f32[392,32], index: 3, kind: output, shape index: {}]  }
   0x1   :  { %721 = vmatprep.subr.bf16.mxu0 %v868_v0  ;;  %v839_v1 = vld [vmem:[%s1310_s1] sm:$0xff]   ;;  %829 = vmatprep.subr.bf16.mxu1 %v868_v0  ;;  %v840_v2 = vld [vmem:[%s1310_s1 + $0x8] sm:$0xff]   ;;  %v841_v3 = vld [vmem:[%s1310_s1 + $0x10] sm:$0xff]  }
   0x2   :  { %729 = vmatprep.mubr.msk.bf16.mxu0 %vm869_vm0, %v868_v0  ;;  %781 = vmatprep.mubr.msk.bf16.mxu1 %vm869_vm0, %v868_v0  ;;  %v842_v4 = vld [vmem:[%s1310_s1 + $0x18] sm:$0xff]   ;;  %v843_v5 = vld [vmem:[%s1311_s0] sm:$0xff]   ;;  %v844_v6 = vld [vmem:[%s1311_s0 + $0x68] sm:$0xff]  }
   0x3   :  { %722 = vmatpush3.bf16.msra.mxu0 %v839_v1  ;;  %833 = vmatpush3.bf16.msra.mxu1 %v839_v1  ;;  %v845_v7 = vld [vmem:[%s1311_s0 + $0x8] sm:$0xff]   ;;  %v846_v8 = vld [vmem:[%s1311_s0 + $0x70] sm:$0xff]   ;;  %v848_v10 = vld [vmem:[%s1311_s0 + $0x78] sm:$0xff]  }
   0x4   :  { %723 = vmatprep.subr.bf16.mxu0 %v868_v0  ;;  %830 = vmatprep.subr.bf16.mxu1 %v868_v0  ;;  %v847_v9 = vld [vmem:[%s1311_s0 + $0x10] sm:$0xff]   ;;  %v849_v11 = vld [vmem:[%s1311_s0 + $0x18] sm:$0xff]   ;;  %v850_v12 = vld [vmem:[%s1311_s0 + $0x80] sm:$0xff]  }
   0x5   :  { %v851_v13 = vld [vmem:[%s1311_s0 + $0x20] sm:$0xff]   ;;  %v852_v14 = vld [vmem:[%s1311_s0 + $0x88] sm:$0xff]   ;;  %v854_v16 = vld [vmem:[%s1311_s0 + $0x90] sm:$0xff]  }
   0x6   :  { %v853_v15 = vld [vmem:[%s1311_s0 + $0x28] sm:$0xff]   ;;  %v855_v17 = vld [vmem:[%s1311_s0 + $0x30] sm:$0xff]   ;;  %v856_v18 = vld [vmem:[%s1311_s0 + $0x98] sm:$0xff]  }
   0x7   :  { %724 = vmatpush3.bf16.msra.mxu0 %v840_v2  ;;  %834 = vmatpush3.bf16.msra.mxu1 %v840_v2  ;;  %v857_v19 = vld [vmem:[%s1311_s0 + $0x38] sm:$0xff]   ;;  %v858_v20 = vld [vmem:[%s1311_s0 + $0xa0] sm:$0xff]   ;;  %v860_v22 = vld [vmem:[%s1311_s0 + $0xa8] sm:$0xff]  }
   0x8   :  { %725 = vmatprep.subr.bf16.mxu0 %v868_v0  ;;  %831 = vmatprep.subr.bf16.mxu1 %v868_v0  ;;  %v859_v21 = vld [vmem:[%s1311_s0 + $0x40] sm:$0xff]   ;;  %v861_v23 = vld [vmem:[%s1311_s0 + $0x48] sm:$0xff]   ;;  %v862_v24 = vld [vmem:[%s1311_s0 + $0xb0] sm:$0xff]  }
   0x9   :  { %v863_v25 = vld [vmem:[%s1311_s0 + $0x50] sm:$0xff]   ;;  %v864_v26 = vld [vmem:[%s1311_s0 + $0xb8] sm:$0xff]   ;;  %v866_v28 = vld [vmem:[%s1311_s0 + $0xc0] ss:$0 sps:$4 sm:$0xff]  }
   0xa   :  { %v865_v27 = vld [vmem:[%s1311_s0 + $0x58] sm:$0xff]   ;;  %v867_v29 = vld [vmem:[%s1311_s0 + $0x60] sm:$0xff]  }
   0xb   :  { %726 = vmatpush3.bf16.msra.mxu0 %v841_v3  ;;  %835 = vmatpush3.bf16.msra.mxu1 %v841_v3  ;;  %v1063_v30 = vld [vmem:[%s1312_s2] ss:$0 sm:$0xff] }
   0xc   :  { %727 = vmatprep.subr.bf16.mxu0 %v868_v0  ;;  %832 = vmatprep.subr.bf16.mxu1 %v868_v0 }
   0xf   :  { %728 = vmatpush3.bf16.msra.mxu0 %v842_v4  ;;  %836 = vmatpush3.bf16.msra.mxu1 %v842_v4 }
  0x12   :  { %730 = vmatmul.mubr.msk.bf16.vlgmr.msra.gmra.mrb[0].mxu0 %vm226_vm1, %v843_v5  ;;  %782 = vmatmul.mubr.msk.bf16.vlgmr.msra.gmra.mrb[0].mxu1 %vm226_vm1, %v844_v6 }
  0x13   :  { %733 = vmatprep.mubr.msk.bf16.mxu0 %vm869_vm0, %v868_v0  ;;  %785 = vmatprep.mubr.msk.bf16.mxu1 %vm869_vm0, %v868_v0 }
  0x1a   :  { %734 = vmatmul.mubr.msk.bf16.gmra.mrb[4].mxu0 %vm226_vm1, %v845_v7  ;;  %786 = vmatmul.mubr.msk.bf16.gmra.mrb[4].mxu1 %vm226_vm1, %v846_v8 }
  0x1b   :  { %737 = vmatprep.mubr.msk.bf16.mxu0 %vm869_vm0, %v868_v0  ;;  %789 = vmatprep.mubr.msk.bf16.mxu1 %vm869_vm0, %v868_v0 }
  0x22   :  { %738 = vmatmul.mubr.msk.bf16.gmra.mrb[8].mxu0 %vm226_vm1, %v847_v9  ;;  %790 = vmatmul.mubr.msk.bf16.gmra.mrb[8].mxu1 %vm226_vm1, %v848_v10 }
  0x23   :  { %741 = vmatprep.mubr.msk.bf16.mxu0 %vm869_vm0, %v868_v0  ;;  %793 = vmatprep.mubr.msk.bf16.mxu1 %vm869_vm0, %v868_v0 }
  0x2a   :  { %742 = vmatmul.mubr.msk.bf16.gmra.mrb[12].mxu0 %vm226_vm1, %v849_v11  ;;  %794 = vmatmul.mubr.msk.bf16.gmra.mrb[12].mxu1 %vm226_vm1, %v850_v12 }
  0x2b   :  { %745 = vmatprep.mubr.msk.bf16.mxu0 %vm869_vm0, %v868_v0  ;;  %797 = vmatprep.mubr.msk.bf16.mxu1 %vm869_vm0, %v868_v0 }
  0x32   :  { %746 = vmatmul.mubr.msk.bf16.gmra.mrb[16].mxu0 %vm226_vm1, %v851_v13  ;;  %798 = vmatmul.mubr.msk.bf16.gmra.mrb[16].mxu1 %vm226_vm1, %v852_v14 }
  0x33   :  { %749 = vmatprep.mubr.msk.bf16.mxu0 %vm869_vm0, %v868_v0  ;;  %801 = vmatprep.mubr.msk.bf16.mxu1 %vm869_vm0, %v868_v0 }
  0x3a   :  { %750 = vmatmul.mubr.msk.bf16.gmra.mrb[20].mxu0 %vm226_vm1, %v853_v15  ;;  %802 = vmatmul.mubr.msk.bf16.gmra.mrb[20].mxu1 %vm226_vm1, %v854_v16 }
  0x3b   :  { %753 = vmatprep.mubr.msk.bf16.mxu0 %vm869_vm0, %v868_v0  ;;  %805 = vmatprep.mubr.msk.bf16.mxu1 %vm869_vm0, %v868_v0 }
  0x42   :  { %754 = vmatmul.mubr.msk.bf16.gmra.mrb[24].mxu0 %vm226_vm1, %v855_v17  ;;  %806 = vmatmul.mubr.msk.bf16.gmra.mrb[24].mxu1 %vm226_vm1, %v856_v18 }
  0x43   :  { %757 = vmatprep.mubr.msk.bf16.mxu0 %vm869_vm0, %v868_v0  ;;  %809 = vmatprep.mubr.msk.bf16.mxu1 %vm869_vm0, %v868_v0 }
  0x4a   :  { %758 = vmatmul.mubr.msk.bf16.gmra.mrb[28].mxu0 %vm226_vm1, %v857_v19  ;;  %810 = vmatmul.mubr.msk.bf16.gmra.mrb[28].mxu1 %vm226_vm1, %v858_v20 }
  0x4b   :  { %761 = vmatprep.mubr.msk.bf16.mxu0 %vm869_vm0, %v868_v0  ;;  %813 = vmatprep.mubr.msk.bf16.mxu1 %vm869_vm0, %v868_v0 }
  0x52   :  { %762 = vmatmul.mubr.msk.bf16.gmra.mrb[32].mxu0 %vm226_vm1, %v859_v21  ;;  %814 = vmatmul.mubr.msk.bf16.gmra.mrb[32].mxu1 %vm226_vm1, %v860_v22 }
  0x53   :  { %765 = vmatprep.mubr.msk.bf16.mxu0 %vm869_vm0, %v868_v0  ;;  %817 = vmatprep.mubr.msk.bf16.mxu1 %vm869_vm0, %v868_v0 }
  0x5a   :  { %766 = vmatmul.mubr.msk.bf16.gmra.mrb[36].mxu0 %vm226_vm1, %v861_v23  ;;  %818 = vmatmul.mubr.msk.bf16.gmra.mrb[36].mxu1 %vm226_vm1, %v862_v24 }
  0x5b   :  { %769 = vmatprep.mubr.msk.bf16.mxu0 %vm869_vm0, %v868_v0  ;;  %821 = vmatprep.mubr.msk.bf16.mxu1 %vm869_vm0, %v868_v0 }
  0x62   :  { %770 = vmatmul.mubr.msk.bf16.gmra.mrb[40].mxu0 %vm226_vm1, %v863_v25  ;;  %822 = vmatmul.mubr.msk.bf16.gmra.mrb[40].mxu1 %vm226_vm1, %v864_v26 }
  0x63   :  { %773 = vmatprep.mubr.msk.bf16.mxu0 %vm869_vm0, %v868_v0  ;;  %825 = vmatprep.mubr.msk.bf16.mxu1 %vm869_vm0, %v868_v0 }
  0x6a   :  { %774 = vmatmul.mubr.msk.bf16.gmra.mrb[44].mxu0 %vm226_vm1, %v865_v27  ;;  %826 = vmatmul.mubr.msk.bf16.gmra.mrb[44].mxu1 %vm226_vm1, %v866_v28 }
  0x6b   :  { %777 = vmatprep.mubr.msk.bf16.mxu0 %vm869_vm0, %v868_v0 }
  0x72   :  { %778 = vmatmul.mubr.msk.bf16.gmra.mrb[48].mxu0 %vm226_vm1, %v867_v29 }
  0xe5   :  { %v336_v31 = vpop.f32.mrb[0].mxu0  ;;  %v440_v32 = vpop.f32.mrb[0].mxu1 }
  0xe6   :  { %v337_v33 = vadd.f32 %v1063_v30, %v336_v31  ;;  %v731_v34 = vpop.f32.mrb[1].mxu0  ;;  %v441_v35 = vadd.f32 %v1063_v30, %v440_v32  ;;  %v783_v36 = vpop.f32.mrb[1].mxu1 }
  0xe7   :  { %v339_v37 = vpop.f32.mrb[2].mxu0  ;;  %v443_v38 = vpop.f32.mrb[2].mxu1 }
  0xe8   :  { %v534_v39 = vmax.f32 %v337_v33, 0.0  ;;  %v340_v40 = vadd.f32 %v1063_v30, %v339_v37  ;;  %v732_v41 = vpop.f32.mrb[3].mxu0  ;;  %v560_v42 = vmax.f32 %v441_v35, 0.0  ;;  %v444_v43 = vadd.f32 %v1063_v30, %v443_v38  ;;  %v784_v44 = vpop.f32.mrb[3].mxu1 }
  0xea   :  { %584 = vst.msk [vmem:[%s1313_s3] sm:$0xff] %vm583_vm2, %v534_v39  ;;  %v535_v45 = vmax.f32 %v340_v40, 0.0  ;;  %610 = vst.msk [vmem:[%s1313_s3 + $0xd0] sm:$0xff] %vm583_vm2, %v560_v42  ;;  %v561_v46 = vmax.f32 %v444_v43, 0.0 }
  0xec   :  { %585 = vst.msk [vmem:[%s1313_s3 + $0x8] sm:$0xff] %vm583_vm2, %v535_v45  ;;  %611 = vst.msk [vmem:[%s1313_s3 + $0xd8] sm:$0xff] %vm583_vm2, %v561_v46 }
  0xed   :  { %v344_v47 = vpop.f32.mrb[4].mxu0  ;;  %v448_v48 = vpop.f32.mrb[4].mxu1 }
  0xee   :  { %v345_v49 = vadd.f32 %v1063_v30, %v344_v47  ;;  %v735_v50 = vpop.f32.mrb[5].mxu0  ;;  %v449_v51 = vadd.f32 %v1063_v30, %v448_v48  ;;  %v787_v52 = vpop.f32.mrb[5].mxu1 }
  0xef   :  { %v347_v53 = vpop.f32.mrb[6].mxu0  ;;  %v451_v54 = vpop.f32.mrb[6].mxu1 }
  0xf0   :  { %v536_v55 = vmax.f32 %v345_v49, 0.0  ;;  %v348_v56 = vadd.f32 %v1063_v30, %v347_v53  ;;  %v736_v57 = vpop.f32.mrb[7].mxu0  ;;  %v562_v58 = vmax.f32 %v449_v51, 0.0  ;;  %v452_v59 = vadd.f32 %v1063_v30, %v451_v54  ;;  %v788_v60 = vpop.f32.mrb[7].mxu1 }
  0xf2   :  { %586 = vst.msk [vmem:[%s1313_s3 + $0x10] sm:$0xff] %vm583_vm2, %v536_v55  ;;  %v537_v61 = vmax.f32 %v348_v56, 0.0  ;;  %612 = vst.msk [vmem:[%s1313_s3 + $0xe0] sm:$0xff] %vm583_vm2, %v562_v58  ;;  %v563_v62 = vmax.f32 %v452_v59, 0.0 }
  0xf4   :  { %587 = vst.msk [vmem:[%s1313_s3 + $0x18] sm:$0xff] %vm583_vm2, %v537_v61  ;;  %613 = vst.msk [vmem:[%s1313_s3 + $0xe8] sm:$0xff] %vm583_vm2, %v563_v62 }
  0xf5   :  { %v352_v63 = vpop.f32.mrb[8].mxu0  ;;  %v456_v0 = vpop.f32.mrb[8].mxu1 }
  0xf6   :  { %v353_v1 = vadd.f32 %v1063_v30, %v352_v63  ;;  %v739_v2 = vpop.f32.mrb[9].mxu0  ;;  %v457_v3 = vadd.f32 %v1063_v30, %v456_v0  ;;  %v791_v4 = vpop.f32.mrb[9].mxu1 }
  0xf7   :  { %v355_v5 = vpop.f32.mrb[10].mxu0  ;;  %v459_v6 = vpop.f32.mrb[10].mxu1 }
  0xf8   :  { %v538_v7 = vmax.f32 %v353_v1, 0.0  ;;  %v356_v8 = vadd.f32 %v1063_v30, %v355_v5  ;;  %v740_v9 = vpop.f32.mrb[11].mxu0  ;;  %v564_v10 = vmax.f32 %v457_v3, 0.0  ;;  %v460_v11 = vadd.f32 %v1063_v30, %v459_v6  ;;  %v792_v12 = vpop.f32.mrb[11].mxu1 }
  0xfa   :  { %588 = vst.msk [vmem:[%s1313_s3 + $0x20] sm:$0xff] %vm583_vm2, %v538_v7  ;;  %v539_v13 = vmax.f32 %v356_v8, 0.0  ;;  %614 = vst.msk [vmem:[%s1313_s3 + $0xf0] sm:$0xff] %vm583_vm2, %v564_v10  ;;  %v565_v14 = vmax.f32 %v460_v11, 0.0 }
  0xfc   :  { %589 = vst.msk [vmem:[%s1313_s3 + $0x28] sm:$0xff] %vm583_vm2, %v539_v13  ;;  %615 = vst.msk [vmem:[%s1313_s3 + $0xf8] sm:$0xff] %vm583_vm2, %v565_v14 }
  0xfd   :  { %v360_v15 = vpop.f32.mrb[12].mxu0  ;;  %v464_v16 = vpop.f32.mrb[12].mxu1 }
  0xfe   :  { %v361_v17 = vadd.f32 %v1063_v30, %v360_v15  ;;  %v743_v18 = vpop.f32.mrb[13].mxu0  ;;  %v465_v19 = vadd.f32 %v1063_v30, %v464_v16  ;;  %v795_v20 = vpop.f32.mrb[13].mxu1 }
  0xff   :  { %v363_v21 = vpop.f32.mrb[14].mxu0  ;;  %v467_v22 = vpop.f32.mrb[14].mxu1 }
 0x100   :  { %v540_v23 = vmax.f32 %v361_v17, 0.0  ;;  %v364_v24 = vadd.f32 %v1063_v30, %v363_v21  ;;  %v744_v25 = vpop.f32.mrb[15].mxu0  ;;  %v566_v26 = vmax.f32 %v465_v19, 0.0  ;;  %v468_v27 = vadd.f32 %v1063_v30, %v467_v22  ;;  %v796_v28 = vpop.f32.mrb[15].mxu1 }
 0x102   :  { %590 = vst.msk [vmem:[%s1313_s3 + $0x30] sm:$0xff] %vm583_vm2, %v540_v23  ;;  %v541_v29 = vmax.f32 %v364_v24, 0.0  ;;  %616 = vst.msk [vmem:[%s1313_s3 + $0x100] sm:$0xff] %vm583_vm2, %v566_v26  ;;  %v567_v31 = vmax.f32 %v468_v27, 0.0 }
 0x104   :  { %591 = vst.msk [vmem:[%s1313_s3 + $0x38] sm:$0xff] %vm583_vm2, %v541_v29  ;;  %617 = vst.msk [vmem:[%s1313_s3 + $0x108] sm:$0xff] %vm583_vm2, %v567_v31 }
 0x105   :  { %v368_v32 = vpop.f32.mrb[16].mxu0  ;;  %v472_v33 = vpop.f32.mrb[16].mxu1 }
 0x106   :  { %v369_v34 = vadd.f32 %v1063_v30, %v368_v32  ;;  %v747_v35 = vpop.f32.mrb[17].mxu0  ;;  %v473_v36 = vadd.f32 %v1063_v30, %v472_v33  ;;  %v799_v37 = vpop.f32.mrb[17].mxu1 }
 0x107   :  { %v371_v38 = vpop.f32.mrb[18].mxu0  ;;  %v475_v39 = vpop.f32.mrb[18].mxu1 }
 0x108   :  { %v542_v40 = vmax.f32 %v369_v34, 0.0  ;;  %v372_v41 = vadd.f32 %v1063_v30, %v371_v38  ;;  %v748_v42 = vpop.f32.mrb[19].mxu0  ;;  %v568_v43 = vmax.f32 %v473_v36, 0.0  ;;  %v476_v44 = vadd.f32 %v1063_v30, %v475_v39  ;;  %v800_v45 = vpop.f32.mrb[19].mxu1 }
 0x10a   :  { %592 = vst.msk [vmem:[%s1313_s3 + $0x40] sm:$0xff] %vm583_vm2, %v542_v40  ;;  %v543_v46 = vmax.f32 %v372_v41, 0.0  ;;  %618 = vst.msk [vmem:[%s1313_s3 + $0x110] sm:$0xff] %vm583_vm2, %v568_v43  ;;  %v569_v47 = vmax.f32 %v476_v44, 0.0 }
 0x10c   :  { %593 = vst.msk [vmem:[%s1313_s3 + $0x48] sm:$0xff] %vm583_vm2, %v543_v46  ;;  %619 = vst.msk [vmem:[%s1313_s3 + $0x118] sm:$0xff] %vm583_vm2, %v569_v47 }
 0x10d   :  { %v376_v48 = vpop.f32.mrb[20].mxu0  ;;  %v480_v49 = vpop.f32.mrb[20].mxu1 }
 0x10e   :  { %v377_v50 = vadd.f32 %v1063_v30, %v376_v48  ;;  %v751_v51 = vpop.f32.mrb[21].mxu0  ;;  %v481_v52 = vadd.f32 %v1063_v30, %v480_v49  ;;  %v803_v53 = vpop.f32.mrb[21].mxu1 }
 0x10f   :  { %v379_v54 = vpop.f32.mrb[22].mxu0  ;;  %v483_v55 = vpop.f32.mrb[22].mxu1 }
 0x110   :  { %v544_v56 = vmax.f32 %v377_v50, 0.0  ;;  %v380_v57 = vadd.f32 %v1063_v30, %v379_v54  ;;  %v752_v58 = vpop.f32.mrb[23].mxu0  ;;  %v570_v59 = vmax.f32 %v481_v52, 0.0  ;;  %v484_v60 = vadd.f32 %v1063_v30, %v483_v55  ;;  %v804_v61 = vpop.f32.mrb[23].mxu1 }
 0x112   :  { %594 = vst.msk [vmem:[%s1313_s3 + $0x50] sm:$0xff] %vm583_vm2, %v544_v56  ;;  %v545_v62 = vmax.f32 %v380_v57, 0.0  ;;  %620 = vst.msk [vmem:[%s1313_s3 + $0x120] sm:$0xff] %vm583_vm2, %v570_v59  ;;  %v571_v63 = vmax.f32 %v484_v60, 0.0 }
 0x114   :  { %595 = vst.msk [vmem:[%s1313_s3 + $0x58] sm:$0xff] %vm583_vm2, %v545_v62  ;;  %621 = vst.msk [vmem:[%s1313_s3 + $0x128] sm:$0xff] %vm583_vm2, %v571_v63 }
 0x115   :  { %v384_v0 = vpop.f32.mrb[24].mxu0  ;;  %v488_v1 = vpop.f32.mrb[24].mxu1 }
 0x116   :  { %v385_v2 = vadd.f32 %v1063_v30, %v384_v0  ;;  %v755_v3 = vpop.f32.mrb[25].mxu0  ;;  %v489_v4 = vadd.f32 %v1063_v30, %v488_v1  ;;  %v807_v5 = vpop.f32.mrb[25].mxu1 }
 0x117   :  { %v387_v6 = vpop.f32.mrb[26].mxu0  ;;  %v491_v7 = vpop.f32.mrb[26].mxu1 }
 0x118   :  { %v546_v8 = vmax.f32 %v385_v2, 0.0  ;;  %v388_v9 = vadd.f32 %v1063_v30, %v387_v6  ;;  %v756_v10 = vpop.f32.mrb[27].mxu0  ;;  %v572_v11 = vmax.f32 %v489_v4, 0.0  ;;  %v492_v12 = vadd.f32 %v1063_v30, %v491_v7  ;;  %v808_v13 = vpop.f32.mrb[27].mxu1 }
 0x11a   :  { %596 = vst.msk [vmem:[%s1313_s3 + $0x60] sm:$0xff] %vm583_vm2, %v546_v8  ;;  %v547_v14 = vmax.f32 %v388_v9, 0.0  ;;  %622 = vst.msk [vmem:[%s1313_s3 + $0x130] sm:$0xff] %vm583_vm2, %v572_v11  ;;  %v573_v15 = vmax.f32 %v492_v12, 0.0 }
 0x11c   :  { %597 = vst.msk [vmem:[%s1313_s3 + $0x68] sm:$0xff] %vm583_vm2, %v547_v14  ;;  %623 = vst.msk [vmem:[%s1313_s3 + $0x138] sm:$0xff] %vm583_vm2, %v573_v15 }
 0x11d   :  { %v392_v16 = vpop.f32.mrb[28].mxu0  ;;  %v496_v17 = vpop.f32.mrb[28].mxu1 }
 0x11e   :  { %v393_v18 = vadd.f32 %v1063_v30, %v392_v16  ;;  %v759_v19 = vpop.f32.mrb[29].mxu0  ;;  %v497_v20 = vadd.f32 %v1063_v30, %v496_v17  ;;  %v811_v21 = vpop.f32.mrb[29].mxu1 }
 0x11f   :  { %v395_v22 = vpop.f32.mrb[30].mxu0  ;;  %v499_v23 = vpop.f32.mrb[30].mxu1 }
 0x120   :  { %v548_v24 = vmax.f32 %v393_v18, 0.0  ;;  %v396_v25 = vadd.f32 %v1063_v30, %v395_v22  ;;  %v760_v26 = vpop.f32.mrb[31].mxu0  ;;  %v574_v27 = vmax.f32 %v497_v20, 0.0  ;;  %v500_v28 = vadd.f32 %v1063_v30, %v499_v23  ;;  %v812_v29 = vpop.f32.mrb[31].mxu1 }
 0x122   :  { %598 = vst.msk [vmem:[%s1313_s3 + $0x70] sm:$0xff] %vm583_vm2, %v548_v24  ;;  %v549_v31 = vmax.f32 %v396_v25, 0.0  ;;  %624 = vst.msk [vmem:[%s1313_s3 + $0x140] sm:$0xff] %vm583_vm2, %v574_v27  ;;  %v575_v32 = vmax.f32 %v500_v28, 0.0 }
 0x124   :  { %599 = vst.msk [vmem:[%s1313_s3 + $0x78] sm:$0xff] %vm583_vm2, %v549_v31  ;;  %625 = vst.msk [vmem:[%s1313_s3 + $0x148] sm:$0xff] %vm583_vm2, %v575_v32 }
 0x125   :  { %v400_v33 = vpop.f32.mrb[32].mxu0  ;;  %v504_v34 = vpop.f32.mrb[32].mxu1 }
 0x126   :  { %v401_v35 = vadd.f32 %v1063_v30, %v400_v33  ;;  %v763_v36 = vpop.f32.mrb[33].mxu0  ;;  %v505_v37 = vadd.f32 %v1063_v30, %v504_v34  ;;  %v815_v38 = vpop.f32.mrb[33].mxu1 }
 0x127   :  { %v403_v39 = vpop.f32.mrb[34].mxu0  ;;  %v507_v40 = vpop.f32.mrb[34].mxu1 }
 0x128   :  { %v550_v41 = vmax.f32 %v401_v35, 0.0  ;;  %v404_v42 = vadd.f32 %v1063_v30, %v403_v39  ;;  %v764_v43 = vpop.f32.mrb[35].mxu0  ;;  %v576_v44 = vmax.f32 %v505_v37, 0.0  ;;  %v508_v45 = vadd.f32 %v1063_v30, %v507_v40  ;;  %v816_v46 = vpop.f32.mrb[35].mxu1 }
 0x12a   :  { %600 = vst.msk [vmem:[%s1313_s3 + $0x80] sm:$0xff] %vm583_vm2, %v550_v41  ;;  %v551_v47 = vmax.f32 %v404_v42, 0.0  ;;  %626 = vst.msk [vmem:[%s1313_s3 + $0x150] sm:$0xff] %vm583_vm2, %v576_v44  ;;  %v577_v48 = vmax.f32 %v508_v45, 0.0 }
 0x12c   :  { %601 = vst.msk [vmem:[%s1313_s3 + $0x88] sm:$0xff] %vm583_vm2, %v551_v47  ;;  %627 = vst.msk [vmem:[%s1313_s3 + $0x158] sm:$0xff] %vm583_vm2, %v577_v48 }
 0x12d   :  { %v408_v49 = vpop.f32.mrb[36].mxu0  ;;  %v512_v50 = vpop.f32.mrb[36].mxu1 }
 0x12e   :  { %v409_v51 = vadd.f32 %v1063_v30, %v408_v49  ;;  %v767_v52 = vpop.f32.mrb[37].mxu0  ;;  %v513_v53 = vadd.f32 %v1063_v30, %v512_v50  ;;  %v819_v54 = vpop.f32.mrb[37].mxu1 }
 0x12f   :  { %v411_v55 = vpop.f32.mrb[38].mxu0  ;;  %v515_v56 = vpop.f32.mrb[38].mxu1 }
 0x130   :  { %v552_v57 = vmax.f32 %v409_v51, 0.0  ;;  %v412_v58 = vadd.f32 %v1063_v30, %v411_v55  ;;  %v768_v59 = vpop.f32.mrb[39].mxu0  ;;  %v578_v60 = vmax.f32 %v513_v53, 0.0  ;;  %v516_v61 = vadd.f32 %v1063_v30, %v515_v56  ;;  %v820_v62 = vpop.f32.mrb[39].mxu1 }
 0x132   :  { %602 = vst.msk [vmem:[%s1313_s3 + $0x90] sm:$0xff] %vm583_vm2, %v552_v57  ;;  %v553_v63 = vmax.f32 %v412_v58, 0.0  ;;  %628 = vst.msk [vmem:[%s1313_s3 + $0x160] sm:$0xff] %vm583_vm2, %v578_v60  ;;  %v579_v0 = vmax.f32 %v516_v61, 0.0 }
 0x134   :  { %603 = vst.msk [vmem:[%s1313_s3 + $0x98] sm:$0xff] %vm583_vm2, %v553_v63  ;;  %629 = vst.msk [vmem:[%s1313_s3 + $0x168] sm:$0xff] %vm583_vm2, %v579_v0 }
 0x135   :  { %v416_v1 = vpop.f32.mrb[40].mxu0  ;;  %v520_v2 = vpop.f32.mrb[40].mxu1 }
 0x136   :  { %v417_v3 = vadd.f32 %v1063_v30, %v416_v1  ;;  %v771_v4 = vpop.f32.mrb[41].mxu0  ;;  %v521_v5 = vadd.f32 %v1063_v30, %v520_v2  ;;  %v823_v6 = vpop.f32.mrb[41].mxu1 }
 0x137   :  { %v419_v7 = vpop.f32.mrb[42].mxu0  ;;  %v523_v8 = vpop.f32.mrb[42].mxu1 }
 0x138   :  { %v554_v9 = vmax.f32 %v417_v3, 0.0  ;;  %v420_v10 = vadd.f32 %v1063_v30, %v419_v7  ;;  %v772_v11 = vpop.f32.mrb[43].mxu0  ;;  %v580_v12 = vmax.f32 %v521_v5, 0.0  ;;  %v524_v13 = vadd.f32 %v1063_v30, %v523_v8  ;;  %v824_v14 = vpop.f32.mrb[43].mxu1 }
 0x13a   :  { %604 = vst.msk [vmem:[%s1313_s3 + $0xa0] sm:$0xff] %vm583_vm2, %v554_v9  ;;  %v555_v15 = vmax.f32 %v420_v10, 0.0  ;;  %630 = vst.msk [vmem:[%s1313_s3 + $0x170] sm:$0xff] %vm583_vm2, %v580_v12  ;;  %v581_v16 = vmax.f32 %v524_v13, 0.0 }
 0x13c   :  { %605 = vst.msk [vmem:[%s1313_s3 + $0xa8] sm:$0xff] %vm583_vm2, %v555_v15  ;;  %631 = vst.msk [vmem:[%s1313_s3 + $0x178] sm:$0xff] %vm583_vm2, %v581_v16 }
 0x13d   :  { %v424_v17 = vpop.f32.mrb[44].mxu0  ;;  %v528_v18 = vpop.f32.mrb[44].mxu1 }
 0x13e   :  { %v425_v19 = vadd.f32 %v1063_v30, %v424_v17  ;;  %v775_v20 = vpop.f32.mrb[45].mxu0  ;;  %v529_v21 = vadd.f32 %v1063_v30, %v528_v18  ;;  %v827_v22 = vpop.f32.mrb[45].mxu1 }
 0x13f   :  { %v427_v23 = vpop.f32.mrb[46].mxu0  ;;  %v531_v24 = vpop.f32.mrb[46].mxu1 }
 0x140   :  { %v556_v25 = vmax.f32 %v425_v19, 0.0  ;;  %v428_v26 = vadd.f32 %v1063_v30, %v427_v23  ;;  %v776_v27 = vpop.f32.mrb[47].mxu0  ;;  %v582_v28 = vmax.f32 %v529_v21, 0.0  ;;  %v828_v29 = vpop.f32.mrb[47].mxu1 }
 0x142   :  { %606 = vst.msk [vmem:[%s1313_s3 + $0xb0] sm:$0xff] %vm583_vm2, %v556_v25  ;;  %v557_v31 = vmax.f32 %v428_v26, 0.0  ;;  %632 = vst.msk [vmem:[%s1313_s3 + $0x180] sm:$0xff] %vm583_vm2, %v582_v28 }
 0x144   :  { %607 = vst.msk [vmem:[%s1313_s3 + $0xb8] sm:$0xff] %vm583_vm2, %v557_v31 }
 0x145   :  { %v432_v32 = vpop.f32.mrb[48].mxu0 }
 0x146   :  { %v433_v33 = vadd.f32 %v1063_v30, %v432_v32  ;;  %v779_v34 = vpop.f32.mrb[49].mxu0 }
 0x147   :  { %v435_v35 = vpop.f32.mrb[50].mxu0 }
 0x148   :  { %v558_v36 = vmax.f32 %v433_v33, 0.0  ;;  %v436_v37 = vadd.f32 %v1063_v30, %v435_v35  ;;  %v780_v38 = vpop.f32.mrb[51].mxu0 }
 0x14a   :  { %608 = vst.msk [vmem:[%s1313_s3 + $0xc0] sm:$0xff] %vm583_vm2, %v558_v36  ;;  %v559_v39 = vmax.f32 %v436_v37, 0.0 }
 0x14c   :  { %609 = vst.msk [vmem:[%s1313_s3 + $0xc8] sm:$0xff] %vm583_vm2, %v559_v39 }

// kernel: vae_forward.4
= control target key start
LH: loop header
LB: loop body
LE: loop exit
PB: predicated region body
PF: predicated region fallthrough
CT: control target
= control target key end

     0   :  { %vm627_vm0 = vcmask 523264   ;;  %vm640_vm1 = vcmask 517120   ;;  %s1158_s1 = inlined_call_operand.vmem [shape: bf16[512,64], index: 1, kind: input, shape index: {}]   ;;  %s1159_s0 = inlined_call_operand.vmem [shape: bf16[98,512], index: 0, kind: input, shape index: {}]   ;;  %s1160_s2 = inlined_call_operand.vmem [shape: f32[1,64], index: 2, kind: input, shape index: {}]   ;;  %s1161_s3 = inlined_call_operand.vmem [shape: f32[98,64], index: 3, kind: output, shape index: {}]  }
   0x1   :  { %v823_v0 = vld [vmem:[%s1158_s1 + $0x40] sm:$0xff]   ;;  %v827_v4 = vld [vmem:[%s1158_s1 + $0x48] sm:$0xff]   ;;  %v831_v8 = vld [vmem:[%s1158_s1 + $0x50] sm:$0xff]  }
   0x2   :  { %v824_v1 = vld [vmem:[%s1158_s1 + $0xc0] sm:$0xff]   ;;  %707 = vmatprep.subr.bf16.mxu0 %v823_v0  ;;  %v828_v5 = vld [vmem:[%s1158_s1 + $0xc8] sm:$0xff]   ;;  %v832_v9 = vld [vmem:[%s1158_s1 + $0xd0] sm:$0xff]  }
   0x3   :  { %v825_v2 = vld [vmem:[%s1158_s1] sm:$0xff]   ;;  %765 = vmatprep.subr.bf16.mxu1 %v824_v1  ;;  %v829_v6 = vld [vmem:[%s1158_s1 + $0x8] sm:$0xff]   ;;  %v833_v10 = vld [vmem:[%s1158_s1 + $0x10] sm:$0xff]  }
   0x4   :  { %v826_v3 = vld [vmem:[%s1158_s1 + $0x80] sm:$0xff]   ;;  %708 = vmatpush3.bf16.msra.mxu0 %v825_v2  ;;  %v830_v7 = vld [vmem:[%s1158_s1 + $0x88] sm:$0xff]   ;;  %v834_v11 = vld [vmem:[%s1158_s1 + $0x90] sm:$0xff]  }
   0x5   :  { %766 = vmatpush3.bf16.msra.mxu1 %v826_v3  ;;  %709 = vmatprep.subr.bf16.mxu0 %v827_v4  ;;  %v835_v12 = vld [vmem:[%s1158_s1 + $0x58] sm:$0xff]   ;;  %v839_v16 = vld [vmem:[%s1158_s1 + $0x60] sm:$0xff]   ;;  %v843_v20 = vld [vmem:[%s1158_s1 + $0x68] sm:$0xff]  }
   0x6   :  { %767 = vmatprep.subr.bf16.mxu1 %v828_v5  ;;  %v836_v13 = vld [vmem:[%s1158_s1 + $0xd8] sm:$0xff]   ;;  %v840_v17 = vld [vmem:[%s1158_s1 + $0xe0] sm:$0xff]   ;;  %v844_v21 = vld [vmem:[%s1158_s1 + $0xe8] sm:$0xff]  }
   0x7   :  { %v837_v14 = vld [vmem:[%s1158_s1 + $0x18] sm:$0xff]   ;;  %v841_v18 = vld [vmem:[%s1158_s1 + $0x20] sm:$0xff]   ;;  %v845_v22 = vld [vmem:[%s1158_s1 + $0x28] sm:$0xff]  }
   0x8   :  { %710 = vmatpush3.bf16.msra.mxu0 %v829_v6  ;;  %v838_v15 = vld [vmem:[%s1158_s1 + $0x98] sm:$0xff]   ;;  %v842_v19 = vld [vmem:[%s1158_s1 + $0xa0] sm:$0xff]   ;;  %v846_v23 = vld [vmem:[%s1158_s1 + $0xa8] sm:$0xff]  }
   0x9   :  { %768 = vmatpush3.bf16.msra.mxu1 %v830_v7  ;;  %711 = vmatprep.subr.bf16.mxu0 %v831_v8  ;;  %v847_v24 = vld [vmem:[%s1158_s1 + $0x70] sm:$0xff]   ;;  %v851_v28 = vld [vmem:[%s1158_s1 + $0x78] sm:$0xff]   ;;  %v39_v54 = vld [vmem:[%s1159_s0 + $0xc0] sm:$0x11] }
   0xa   :  { %769 = vmatprep.subr.bf16.mxu1 %v832_v9  ;;  %v848_v25 = vld [vmem:[%s1158_s1 + $0xf0] sm:$0xff]   ;;  %v852_v29 = vld [vmem:[%s1158_s1 + $0xf8] sm:$0xff]   ;;  %v40_v55 = vld [vmem:[%s1159_s0 + $0xc8] sm:$0x11]  ;;  %v672_v58 = vcombine.high %v39_v54, %v39_v54  ;;  %v671_v60 = vcombine.low %v39_v54, %v39_v54 }
   0xb   :  { %v849_v26 = vld [vmem:[%s1158_s1 + $0x30] sm:$0xff]   ;;  %v853_v30 = vld [vmem:[%s1158_s1 + $0x38] sm:$0xff]   ;;  %v674_v59 = vcombine.high %v40_v55, %v40_v55  ;;  %v673_v61 = vcombine.low %v40_v55, %v40_v55  ;;  %v1092_v0 = vld [vmem:[%s1160_s2] ss:$0 sm:$0xff] }
   0xc   :  { %712 = vmatpush3.bf16.msra.mxu0 %v833_v10  ;;  %v850_v27 = vld [vmem:[%s1158_s1 + $0xb0] sm:$0xff]   ;;  %v854_v31 = vld [vmem:[%s1158_s1 + $0xb8] sm:$0xff]  }
   0xd   :  { %770 = vmatpush3.bf16.msra.mxu1 %v834_v11  ;;  %713 = vmatprep.subr.bf16.mxu0 %v835_v12  ;;  %v855_v32 = vld [vmem:[%s1159_s0] ss:$16 sps:$4 sm:$0xff]   ;;  %v857_v33 = vld [vmem:[%s1159_s0 + $0x4] ss:$16 sps:$4 sm:$0xff]   ;;  %v858_v34 = vld [vmem:[%s1159_s0 + $0x8] ss:$16 sps:$4 sm:$0xff]  }
   0xe   :  { %771 = vmatprep.subr.bf16.mxu1 %v836_v13  ;;  %v860_v35 = vld [vmem:[%s1159_s0 + $0xc] ss:$16 sps:$4 sm:$0xff]   ;;  %470 = vmatprep.mubr.bf16.mxu0 %v857_v33  ;;  %v861_v36 = vld [vmem:[%s1159_s0 + $0x24] ss:$16 sps:$4 sm:$0xff]   ;;  %v865_v38 = vld [vmem:[%s1159_s0 + $0x20] ss:$16 sps:$4 sm:$0xff]  }
   0xf   :  { %558 = vmatprep.mubr.bf16.mxu1 %v860_v35  ;;  %v863_v37 = vld [vmem:[%s1159_s0 + $0x2c] ss:$16 sps:$4 sm:$0xff]   ;;  %v866_v39 = vld [vmem:[%s1159_s0 + $0x28] ss:$16 sps:$4 sm:$0xff]   ;;  %v867_v40 = vld [vmem:[%s1159_s0 + $0x44] ss:$16 sps:$4 sm:$0xff]  }
  0x10   :  { %714 = vmatpush3.bf16.msra.mxu0 %v837_v14  ;;  %v869_v41 = vld [vmem:[%s1159_s0 + $0x4c] ss:$16 sps:$4 sm:$0xff]   ;;  %v871_v42 = vld [vmem:[%s1159_s0 + $0x40] ss:$16 sps:$4 sm:$0xff]   ;;  %v872_v43 = vld [vmem:[%s1159_s0 + $0x48] ss:$16 sps:$4 sm:$0xff]  }
  0x11   :  { %772 = vmatpush3.bf16.msra.mxu1 %v838_v15  ;;  %715 = vmatprep.subr.bf16.mxu0 %v839_v16  ;;  %v873_v44 = vld [vmem:[%s1159_s0 + $0x64] ss:$16 sps:$4 sm:$0xff]   ;;  %v875_v45 = vld [vmem:[%s1159_s0 + $0x6c] ss:$16 sps:$4 sm:$0xff]   ;;  %v877_v46 = vld [vmem:[%s1159_s0 + $0x60] ss:$16 sps:$4 sm:$0xff]  }
  0x12   :  { %773 = vmatprep.subr.bf16.mxu1 %v840_v17  ;;  %v878_v47 = vld [vmem:[%s1159_s0 + $0x68] ss:$16 sps:$4 sm:$0xff]   ;;  %v879_v48 = vld [vmem:[%s1159_s0 + $0x84] ss:$16 sps:$4 sm:$0xff]   ;;  %v881_v49 = vld [vmem:[%s1159_s0 + $0x8c] ss:$16 sps:$4 sm:$0xff]  }
  0x13   :  { %v883_v50 = vld [vmem:[%s1159_s0 + $0x80] ss:$16 sps:$4 sm:$0xff]   ;;  %v884_v51 = vld [vmem:[%s1159_s0 + $0x88] ss:$16 sps:$4 sm:$0xff]   ;;  %v885_v52 = vld [vmem:[%s1159_s0 + $0xa4] ss:$16 sps:$4 sm:$0xff]  }
  0x14   :  { %716 = vmatpush3.bf16.msra.mxu0 %v841_v18  ;;  %v887_v53 = vld [vmem:[%s1159_s0 + $0xac] ss:$16 sps:$4 sm:$0xff]   ;;  %v889_v56 = vld [vmem:[%s1159_s0 + $0xa0] ss:$16 sps:$4 sm:$0xff]   ;;  %v890_v57 = vld [vmem:[%s1159_s0 + $0xa8] ss:$16 sps:$4 sm:$0xff]  }
  0x15   :  { %774 = vmatpush3.bf16.msra.mxu1 %v842_v19  ;;  %717 = vmatprep.subr.bf16.mxu0 %v843_v20 }
  0x16   :  { %775 = vmatprep.subr.bf16.mxu1 %v844_v21 }
  0x18   :  { %718 = vmatpush3.bf16.msra.mxu0 %v845_v22 }
  0x19   :  { %776 = vmatpush3.bf16.msra.mxu1 %v846_v23  ;;  %719 = vmatprep.subr.bf16.mxu0 %v847_v24 }
  0x1a   :  { %777 = vmatprep.subr.bf16.mxu1 %v848_v25 }
  0x1c   :  { %720 = vmatpush3.bf16.msra.mxu0 %v849_v26 }
  0x1d   :  { %778 = vmatpush3.bf16.msra.mxu1 %v850_v27  ;;  %721 = vmatprep.subr.bf16.mxu0 %v851_v28 }
  0x1e   :  { %779 = vmatprep.subr.bf16.mxu1 %v852_v29 }
  0x20   :  { %722 = vmatpush3.bf16.msra.mxu0 %v853_v30 }
  0x21   :  { %780 = vmatpush3.bf16.msra.mxu1 %v854_v31 }
  0x23   :  { %471 = vmatmul.mubr.bf16.vlgmr.msra.gmra.mrb[0].mxu0 %v855_v32 }
  0x24   :  { %559 = vmatmul.mubr.bf16.vlgmr.msra.gmra.mrb[0].mxu1 %v858_v34  ;;  %478 = vmatprep.mubr.bf16.mxu0 %v861_v36 }
  0x25   :  { %566 = vmatprep.mubr.bf16.mxu1 %v863_v37 }
  0x2b   :  { %479 = vmatmul.mubr.bf16.gmra.mrb[4].mxu0 %v865_v38 }
  0x2c   :  { %567 = vmatmul.mubr.bf16.gmra.mrb[4].mxu1 %v866_v39  ;;  %486 = vmatprep.mubr.bf16.mxu0 %v867_v40 }
  0x2d   :  { %574 = vmatprep.mubr.bf16.mxu1 %v869_v41 }
  0x33   :  { %487 = vmatmul.mubr.bf16.gmra.mrb[8].mxu0 %v871_v42 }
  0x34   :  { %575 = vmatmul.mubr.bf16.gmra.mrb[8].mxu1 %v872_v43  ;;  %494 = vmatprep.mubr.bf16.mxu0 %v873_v44 }
  0x35   :  { %582 = vmatprep.mubr.bf16.mxu1 %v875_v45 }
  0x3b   :  { %495 = vmatmul.mubr.bf16.gmra.mrb[12].mxu0 %v877_v46 }
  0x3c   :  { %583 = vmatmul.mubr.bf16.gmra.mrb[12].mxu1 %v878_v47  ;;  %502 = vmatprep.mubr.bf16.mxu0 %v879_v48 }
  0x3d   :  { %590 = vmatprep.mubr.bf16.mxu1 %v881_v49 }
  0x43   :  { %503 = vmatmul.mubr.bf16.gmra.mrb[16].mxu0 %v883_v50 }
  0x44   :  { %591 = vmatmul.mubr.bf16.gmra.mrb[16].mxu1 %v884_v51  ;;  %510 = vmatprep.mubr.bf16.mxu0 %v885_v52 }
  0x45   :  { %598 = vmatprep.mubr.bf16.mxu1 %v887_v53 }
  0x4b   :  { %511 = vmatmul.mubr.bf16.gmra.mrb[20].mxu0 %v889_v56 }
  0x4c   :  { %599 = vmatmul.mubr.bf16.gmra.mrb[20].mxu1 %v890_v57  ;;  %518 = vmatprep.mubr.bf16.mxu0 %v672_v58 }
  0x4d   :  { %606 = vmatprep.mubr.bf16.mxu1 %v674_v59 }
  0x53   :  { %519 = vmatmul.mubr.bf16.gmra.mrb[24].mxu0 %v671_v60 }
  0x54   :  { %607 = vmatmul.mubr.bf16.gmra.mrb[24].mxu1 %v673_v61 }
  0xf6   :  { %v723_v62 = vpop.f32.mrb[0].mxu0 }
  0xf7   :  { %v781_v63 = vpop.f32.mrb[0].mxu1  ;;  %v724_v1 = vpop.f32.mrb[1].mxu0 }
  0xf8   :  { %v725_v2 = vadd.f32 %v724_v1, %v723_v62  ;;  %v782_v3 = vpop.f32.mrb[1].mxu1  ;;  %v726_v4 = vpop.f32.mrb[2].mxu0 }
  0xf9   :  { %v783_v5 = vadd.f32 %v782_v3, %v781_v63  ;;  %v784_v6 = vpop.f32.mrb[2].mxu1  ;;  %v727_v7 = vpop.f32.mrb[3].mxu0 }
  0xfa   :  { %v473_v8 = vadd.f32 %v725_v2, %v1092_v0  ;;  %v728_v9 = vadd.f32 %v727_v7, %v726_v4  ;;  %v785_v10 = vpop.f32.mrb[3].mxu1 }
  0xfb   :  { %v786_v11 = vadd.f32 %v785_v10, %v784_v6 }
  0xfc   :  { %v561_v12 = vadd.f32 %v783_v5, %v473_v8  ;;  %v476_v13 = vadd.f32 %v728_v9, %v1092_v0 }
  0xfe   :  { %v614_v14 = vmax.f32 %v561_v12, 0.0  ;;  %v564_v15 = vadd.f32 %v786_v11, %v476_v13  ;;  %v729_v16 = vpop.f32.mrb[4].mxu0 }
  0xff   :  { %v787_v17 = vpop.f32.mrb[4].mxu1  ;;  %v730_v18 = vpop.f32.mrb[5].mxu0 }
 0x100   :  { %628 = vst.msk [vmem:[%s1161_s3] sm:$0xff] %vm627_vm0, %v614_v14  ;;  %v615_v19 = vmax.f32 %v564_v15, 0.0  ;;  %v731_v20 = vadd.f32 %v730_v18, %v729_v16  ;;  %v788_v21 = vpop.f32.mrb[5].mxu1  ;;  %v732_v22 = vpop.f32.mrb[6].mxu0 }
 0x101   :  { %v789_v23 = vadd.f32 %v788_v21, %v787_v17  ;;  %v790_v24 = vpop.f32.mrb[6].mxu1  ;;  %v733_v25 = vpop.f32.mrb[7].mxu0 }
 0x102   :  { %629 = vst.msk [vmem:[%s1161_s3 + $0x8] sm:$0xff] %vm627_vm0, %v615_v19  ;;  %v481_v26 = vadd.f32 %v731_v20, %v1092_v0  ;;  %v734_v27 = vadd.f32 %v733_v25, %v732_v22  ;;  %v791_v28 = vpop.f32.mrb[7].mxu1 }
 0x103   :  { %v792_v29 = vadd.f32 %v791_v28, %v790_v24 }
 0x104   :  { %v569_v30 = vadd.f32 %v789_v23, %v481_v26  ;;  %v484_v31 = vadd.f32 %v734_v27, %v1092_v0 }
 0x106   :  { %v616_v32 = vmax.f32 %v569_v30, 0.0  ;;  %v572_v33 = vadd.f32 %v792_v29, %v484_v31  ;;  %v735_v34 = vpop.f32.mrb[8].mxu0 }
 0x107   :  { %v793_v35 = vpop.f32.mrb[8].mxu1  ;;  %v736_v36 = vpop.f32.mrb[9].mxu0 }
 0x108   :  { %630 = vst.msk [vmem:[%s1161_s3 + $0x10] sm:$0xff] %vm627_vm0, %v616_v32  ;;  %v617_v37 = vmax.f32 %v572_v33, 0.0  ;;  %v737_v38 = vadd.f32 %v736_v36, %v735_v34  ;;  %v794_v39 = vpop.f32.mrb[9].mxu1  ;;  %v738_v40 = vpop.f32.mrb[10].mxu0 }
 0x109   :  { %v795_v41 = vadd.f32 %v794_v39, %v793_v35  ;;  %v796_v42 = vpop.f32.mrb[10].mxu1  ;;  %v739_v43 = vpop.f32.mrb[11].mxu0 }
 0x10a   :  { %631 = vst.msk [vmem:[%s1161_s3 + $0x18] sm:$0xff] %vm627_vm0, %v617_v37  ;;  %v489_v44 = vadd.f32 %v737_v38, %v1092_v0  ;;  %v740_v45 = vadd.f32 %v739_v43, %v738_v40  ;;  %v797_v46 = vpop.f32.mrb[11].mxu1 }
 0x10b   :  { %v798_v47 = vadd.f32 %v797_v46, %v796_v42 }
 0x10c   :  { %v577_v48 = vadd.f32 %v795_v41, %v489_v44  ;;  %v492_v49 = vadd.f32 %v740_v45, %v1092_v0 }
 0x10e   :  { %v618_v50 = vmax.f32 %v577_v48, 0.0  ;;  %v580_v51 = vadd.f32 %v798_v47, %v492_v49  ;;  %v741_v52 = vpop.f32.mrb[12].mxu0 }
 0x10f   :  { %v799_v53 = vpop.f32.mrb[12].mxu1  ;;  %v742_v54 = vpop.f32.mrb[13].mxu0 }
 0x110   :  { %632 = vst.msk [vmem:[%s1161_s3 + $0x20] sm:$0xff] %vm627_vm0, %v618_v50  ;;  %v619_v55 = vmax.f32 %v580_v51, 0.0  ;;  %v743_v56 = vadd.f32 %v742_v54, %v741_v52  ;;  %v800_v57 = vpop.f32.mrb[13].mxu1  ;;  %v744_v58 = vpop.f32.mrb[14].mxu0 }
 0x111   :  { %v801_v59 = vadd.f32 %v800_v57, %v799_v53  ;;  %v802_v60 = vpop.f32.mrb[14].mxu1  ;;  %v745_v61 = vpop.f32.mrb[15].mxu0 }
 0x112   :  { %633 = vst.msk [vmem:[%s1161_s3 + $0x28] sm:$0xff] %vm627_vm0, %v619_v55  ;;  %v497_v62 = vadd.f32 %v743_v56, %v1092_v0  ;;  %v746_v63 = vadd.f32 %v745_v61, %v744_v58  ;;  %v803_v1 = vpop.f32.mrb[15].mxu1 }
 0x113   :  { %v804_v2 = vadd.f32 %v803_v1, %v802_v60 }
 0x114   :  { %v585_v3 = vadd.f32 %v801_v59, %v497_v62  ;;  %v500_v4 = vadd.f32 %v746_v63, %v1092_v0 }
 0x116   :  { %v620_v5 = vmax.f32 %v585_v3, 0.0  ;;  %v588_v6 = vadd.f32 %v804_v2, %v500_v4  ;;  %v747_v7 = vpop.f32.mrb[16].mxu0 }
 0x117   :  { %v805_v8 = vpop.f32.mrb[16].mxu1  ;;  %v748_v9 = vpop.f32.mrb[17].mxu0 }
 0x118   :  { %634 = vst.msk [vmem:[%s1161_s3 + $0x30] sm:$0xff] %vm627_vm0, %v620_v5  ;;  %v621_v10 = vmax.f32 %v588_v6, 0.0  ;;  %v749_v11 = vadd.f32 %v748_v9, %v747_v7  ;;  %v806_v12 = vpop.f32.mrb[17].mxu1  ;;  %v750_v13 = vpop.f32.mrb[18].mxu0 }
 0x119   :  { %v807_v14 = vadd.f32 %v806_v12, %v805_v8  ;;  %v808_v15 = vpop.f32.mrb[18].mxu1  ;;  %v751_v16 = vpop.f32.mrb[19].mxu0 }
 0x11a   :  { %635 = vst.msk [vmem:[%s1161_s3 + $0x38] sm:$0xff] %vm627_vm0, %v621_v10  ;;  %v505_v17 = vadd.f32 %v749_v11, %v1092_v0  ;;  %v752_v18 = vadd.f32 %v751_v16, %v750_v13  ;;  %v809_v19 = vpop.f32.mrb[19].mxu1 }
 0x11b   :  { %v810_v20 = vadd.f32 %v809_v19, %v808_v15 }
 0x11c   :  { %v593_v21 = vadd.f32 %v807_v14, %v505_v17  ;;  %v508_v22 = vadd.f32 %v752_v18, %v1092_v0 }
 0x11e   :  { %v622_v23 = vmax.f32 %v593_v21, 0.0  ;;  %v596_v24 = vadd.f32 %v810_v20, %v508_v22  ;;  %v753_v25 = vpop.f32.mrb[20].mxu0 }
 0x11f   :  { %v811_v26 = vpop.f32.mrb[20].mxu1  ;;  %v754_v27 = vpop.f32.mrb[21].mxu0 }
 0x120   :  { %636 = vst.msk [vmem:[%s1161_s3 + $0x40] sm:$0xff] %vm627_vm0, %v622_v23  ;;  %v623_v28 = vmax.f32 %v596_v24, 0.0  ;;  %v755_v29 = vadd.f32 %v754_v27, %v753_v25  ;;  %v812_v30 = vpop.f32.mrb[21].mxu1  ;;  %v756_v31 = vpop.f32.mrb[22].mxu0 }
 0x121   :  { %v813_v32 = vadd.f32 %v812_v30, %v811_v26  ;;  %v814_v33 = vpop.f32.mrb[22].mxu1  ;;  %v757_v34 = vpop.f32.mrb[23].mxu0 }
 0x122   :  { %637 = vst.msk [vmem:[%s1161_s3 + $0x48] sm:$0xff] %vm627_vm0, %v623_v28  ;;  %v513_v35 = vadd.f32 %v755_v29, %v1092_v0  ;;  %v758_v36 = vadd.f32 %v757_v34, %v756_v31  ;;  %v815_v37 = vpop.f32.mrb[23].mxu1 }
 0x123   :  { %v816_v38 = vadd.f32 %v815_v37, %v814_v33 }
 0x124   :  { %v601_v39 = vadd.f32 %v813_v32, %v513_v35  ;;  %v516_v40 = vadd.f32 %v758_v36, %v1092_v0 }
 0x126   :  { %v624_v41 = vmax.f32 %v601_v39, 0.0  ;;  %v604_v42 = vadd.f32 %v816_v38, %v516_v40  ;;  %v759_v43 = vpop.f32.mrb[24].mxu0 }
 0x127   :  { %v817_v44 = vpop.f32.mrb[24].mxu1  ;;  %v760_v45 = vpop.f32.mrb[25].mxu0 }
 0x128   :  { %638 = vst.msk [vmem:[%s1161_s3 + $0x50] sm:$0xff] %vm627_vm0, %v624_v41  ;;  %v625_v46 = vmax.f32 %v604_v42, 0.0  ;;  %v761_v47 = vadd.f32 %v760_v45, %v759_v43  ;;  %v818_v48 = vpop.f32.mrb[25].mxu1  ;;  %v762_v49 = vpop.f32.mrb[26].mxu0 }
 0x129   :  { %v819_v50 = vadd.f32 %v818_v48, %v817_v44  ;;  %v820_v51 = vpop.f32.mrb[26].mxu1  ;;  %v763_v52 = vpop.f32.mrb[27].mxu0 }
 0x12a   :  { %639 = vst.msk [vmem:[%s1161_s3 + $0x58] sm:$0xff] %vm627_vm0, %v625_v46  ;;  %v521_v53 = vadd.f32 %v761_v47, %v1092_v0  ;;  %v821_v54 = vpop.f32.mrb[27].mxu1 }
 0x12c   :  { %v609_v55 = vadd.f32 %v819_v50, %v521_v53 }
 0x12e   :  { %v626_v56 = vmax.f32 %v609_v55, 0.0 }
 0x130   :  { %641 = vst.msk [vmem:[%s1161_s3 + $0x60] sm:$0x3] %vm640_vm1, %v626_v56 }

// kernel: vae_forward.5
= control target key start
LH: loop header
LB: loop body
LE: loop exit
PB: predicated region body
PF: predicated region fallthrough
CT: control target
= control target key end

     0   :  { %v420_v36 = vlaneseq  ;;  %v4428_v37 = vmov 1966171168   ;;  %s5823_s0 = inlined_call_operand.vmem [shape: bf16[2,3136], index: 0, kind: input, shape index: {}]   ;;  %s5824_s1 = inlined_call_operand.vmem [shape: bf16[3136,256], index: 1, kind: input, shape index: {}]   ;;  %s5825_s2 = inlined_call_operand.vmem [shape: f32[1,256], index: 2, kind: input, shape index: {}]   ;;  %s5826_s3 = inlined_call_operand.vmem [shape: bf16[256,32], index: 3, kind: input, shape index: {}]   ;;  %s5827_s4 = inlined_call_operand.vmem [shape: f32[1,32], index: 4, kind: input, shape index: {}]   ;;  %s5828_s5 = inlined_call_operand.hbm [shape: f32[2,32], index: 5, kind: output, shape index: {}]  }
   0x1   :  { %v3795_v0 = vld [vmem:[%s5824_s1 + $0x4] ss:$8 sps:$4 sm:$0xff]   ;;  %v3799_v2 = vld [vmem:[%s5824_s1] ss:$8 sps:$4 sm:$0xff]   ;;  %v3801_v4 = vld [vmem:[%s5824_s1 + $0x14] ss:$8 sps:$4 sm:$0xff]   ;;  %v436_v38 = vunpack.c.l.s4 %v4428_v37 }
   0x2   :  { %v3797_v1 = vld [vmem:[%s5824_s1 + $0x604] ss:$8 sps:$4 sm:$0xff]   ;;  %2583 = vmatprep.subr.bf16.mxu1 %v3795_v0  ;;  %v3800_v3 = vld [vmem:[%s5824_s1 + $0x600] ss:$8 sps:$4 sm:$0xff]   ;;  %v3803_v5 = vld [vmem:[%s5824_s1 + $0x614] ss:$8 sps:$4 sm:$0xff]  }
   0x3   :  { %2829 = vmatprep.subr.bf16.mxu0 %v3797_v1  ;;  %2584 = vmatpush1.bf16.msra.mxu1 %v3799_v2  ;;  %v3805_v6 = vld [vmem:[%s5824_s1 + $0x10] ss:$8 sps:$4 sm:$0xff]   ;;  %v3807_v8 = vld [vmem:[%s5824_s1 + $0x24] ss:$8 sps:$4 sm:$0xff]   ;;  %v3811_v10 = vld [vmem:[%s5824_s1 + $0x20] ss:$8 sps:$4 sm:$0xff]   ;;  %v437_v43 = vunpack.c.0.s8 %v436_v38 }
   0x4   :  { %2830 = vmatpush1.bf16.msra.mxu0 %v3800_v3  ;;  %2585 = vmatprep.subr.bf16.mxu1 %v3801_v4  ;;  %v3806_v7 = vld [vmem:[%s5824_s1 + $0x610] ss:$8 sps:$4 sm:$0xff]   ;;  %v3809_v9 = vld [vmem:[%s5824_s1 + $0x624] ss:$8 sps:$4 sm:$0xff]   ;;  %v3812_v11 = vld [vmem:[%s5824_s1 + $0x620] ss:$8 sps:$4 sm:$0xff]  }
   0x5   :  { %2831 = vmatprep.subr.bf16.mxu0 %v3803_v5  ;;  %v3813_v12 = vld [vmem:[%s5824_s1 + $0x34] ss:$8 sps:$4 sm:$0xff]   ;;  %v3817_v14 = vld [vmem:[%s5824_s1 + $0x30] ss:$8 sps:$4 sm:$0xff]   ;;  %v3819_v16 = vld [vmem:[%s5824_s1 + $0x44] ss:$8 sps:$4 sm:$0xff]  }
   0x6   :  { %v3815_v13 = vld [vmem:[%s5824_s1 + $0x634] ss:$8 sps:$4 sm:$0xff]   ;;  %v3818_v15 = vld [vmem:[%s5824_s1 + $0x630] ss:$8 sps:$4 sm:$0xff]   ;;  %v3821_v17 = vld [vmem:[%s5824_s1 + $0x644] ss:$8 sps:$4 sm:$0xff]  }
   0x7   :  { %2586 = vmatpush1.bf16.msra.mxu1 %v3805_v6  ;;  %v3823_v18 = vld [vmem:[%s5824_s1 + $0x40] ss:$8 sps:$4 sm:$0xff]   ;;  %v3825_v20 = vld [vmem:[%s5824_s1 + $0x54] ss:$8 sps:$4 sm:$0xff]   ;;  %v3829_v22 = vld [vmem:[%s5824_s1 + $0x50] ss:$8 sps:$4 sm:$0xff]  }
   0x8   :  { %2832 = vmatpush1.bf16.msra.mxu0 %v3806_v7  ;;  %2587 = vmatprep.subr.bf16.mxu1 %v3807_v8  ;;  %v3824_v19 = vld [vmem:[%s5824_s1 + $0x640] ss:$8 sps:$4 sm:$0xff]   ;;  %v3827_v21 = vld [vmem:[%s5824_s1 + $0x654] ss:$8 sps:$4 sm:$0xff]   ;;  %v3830_v23 = vld [vmem:[%s5824_s1 + $0x650] ss:$8 sps:$4 sm:$0xff]  }
   0x9   :  { %2833 = vmatprep.subr.bf16.mxu0 %v3809_v9  ;;  %v3831_v24 = vld [vmem:[%s5824_s1 + $0x64] ss:$8 sps:$4 sm:$0xff]   ;;  %v3835_v26 = vld [vmem:[%s5824_s1 + $0x60] ss:$8 sps:$4 sm:$0xff]   ;;  %v3837_v28 = vld [vmem:[%s5824_s1 + $0x74] ss:$8 sps:$4 sm:$0xff]  }
   0xa   :  { %v3833_v25 = vld [vmem:[%s5824_s1 + $0x664] ss:$8 sps:$4 sm:$0xff]   ;;  %v3836_v27 = vld [vmem:[%s5824_s1 + $0x660] ss:$8 sps:$4 sm:$0xff]   ;;  %v3839_v29 = vld [vmem:[%s5824_s1 + $0x674] ss:$8 sps:$4 sm:$0xff]  }
   0xb   :  { %2588 = vmatpush1.bf16.msra.mxu1 %v3811_v10  ;;  %v3841_v30 = vld [vmem:[%s5824_s1 + $0x70] ss:$8 sps:$4 sm:$0xff]   ;;  %v3843_v32 = vld [vmem:[%s5824_s1 + $0x84] ss:$8 sps:$4 sm:$0xff]   ;;  %v3847_v34 = vld [vmem:[%s5824_s1 + $0x80] ss:$8 sps:$4 sm:$0xff]  }
   0xc   :  { %2834 = vmatpush1.bf16.msra.mxu0 %v3812_v11  ;;  %2589 = vmatprep.subr.bf16.mxu1 %v3813_v12  ;;  %v3842_v31 = vld [vmem:[%s5824_s1 + $0x670] ss:$8 sps:$4 sm:$0xff]   ;;  %v3845_v33 = vld [vmem:[%s5824_s1 + $0x684] ss:$8 sps:$4 sm:$0xff]   ;;  %v3848_v35 = vld [vmem:[%s5824_s1 + $0x680] ss:$8 sps:$4 sm:$0xff]  }
   0xd   :  { %2835 = vmatprep.subr.bf16.mxu0 %v3815_v13  ;;  %v3849_v39 = vld [vmem:[%s5824_s1 + $0x94] ss:$8 sps:$4 sm:$0xff]   ;;  %v3853_v41 = vld [vmem:[%s5824_s1 + $0x90] ss:$8 sps:$4 sm:$0xff]   ;;  %v4578_v42 = vshrl.u32 %v420_v36, 7  ;;  %v4607_v52 = vld [vmem:[%s5823_s0] sm:$0xff] }
   0xe   :  { %v3851_v40 = vld [vmem:[%s5824_s1 + $0x694] ss:$8 sps:$4 sm:$0xff]   ;;  %v3854_v44 = vld [vmem:[%s5824_s1 + $0x690] ss:$8 sps:$4 sm:$0xff]   ;;  %v3855_v45 = vld [vmem:[%s5824_s1 + $0xa4] ss:$8 sps:$4 sm:$0xff]  }
   0xf   :  { %2590 = vmatpush1.bf16.msra.mxu1 %v3817_v14  ;;  %v3857_v46 = vld [vmem:[%s5824_s1 + $0x6a4] ss:$8 sps:$4 sm:$0xff]   ;;  %v3859_v47 = vld [vmem:[%s5824_s1 + $0xa0] ss:$8 sps:$4 sm:$0xff]   ;;  %v4596_v49 = vsub.s32 %v437_v43, %v4578_v42  ;;  %v3861_v50 = vld [vmem:[%s5824_s1 + $0xb4] ss:$8 sps:$4 sm:$0xff]  }
  0x10   :  { %2836 = vmatpush1.bf16.msra.mxu0 %v3818_v15  ;;  %2591 = vmatprep.subr.bf16.mxu1 %v3819_v16  ;;  %v3860_v48 = vld [vmem:[%s5824_s1 + $0x6a0] ss:$8 sps:$4 sm:$0xff]   ;;  %v3863_v51 = vld [vmem:[%s5824_s1 + $0x6b4] ss:$8 sps:$4 sm:$0xff]   ;;  %v3865_v53 = vld [vmem:[%s5824_s1 + $0xb0] ss:$8 sps:$4 sm:$0xff]  }
  0x11   :  { %2837 = vmatprep.subr.bf16.mxu0 %v3821_v17  ;;  %v441_v54 = vrot.slane %v4607_v52, %v4596_v49  ;;  %v3866_v55 = vld [vmem:[%s5824_s1 + $0x6b0] ss:$8 sps:$4 sm:$0xff]   ;;  %v23_v56 = vld [vmem:[%s5823_s0 + $0x8] sm:$0xff]  ;;  %v3873_v1 = vld [vmem:[%s5824_s1 + $0xd4] ss:$8 sps:$4 sm:$0xff]  }
  0x12   :  { %v3867_v57 = vld [vmem:[%s5824_s1 + $0xc4] ss:$8 sps:$4 sm:$0xff]   ;;  %v483_v60 = vcombine.high %v23_v56, %v23_v56  ;;  %v3871_v63 = vld [vmem:[%s5824_s1 + $0xc0] ss:$8 sps:$4 sm:$0xff]   ;;  %v3875_v2 = vld [vmem:[%s5824_s1 + $0x6d4] ss:$8 sps:$4 sm:$0xff]  }
  0x13   :  { %2592 = vmatpush1.bf16.msra.mxu1 %v3823_v18  ;;  %v3869_v58 = vld [vmem:[%s5824_s1 + $0x6c4] ss:$8 sps:$4 sm:$0xff]   ;;  %v449_v59 = vcombine.high %v441_v54, %v441_v54  ;;  %v3872_v0 = vld [vmem:[%s5824_s1 + $0x6c0] ss:$8 sps:$4 sm:$0xff]   ;;  %v3877_v5 = vld [vmem:[%s5824_s1 + $0xd0] ss:$8 sps:$4 sm:$0xff]   ;;  %v4678_v17 = vrot.slane %v441_v54, %v4596_v49 }
  0x14   :  { %2838 = vmatpush1.bf16.msra.mxu0 %v3824_v19  ;;  %2593 = vmatprep.subr.bf16.mxu1 %v3825_v20  ;;  %v497_v62 = vrot.slane %v483_v60, %v4596_v49  ;;  %v3878_v6 = vld [vmem:[%s5824_s1 + $0x6d0] ss:$8 sps:$4 sm:$0xff]   ;;  %v3879_v7 = vld [vmem:[%s5824_s1 + $0xe4] ss:$8 sps:$4 sm:$0xff]   ;;  %v3883_v9 = vld [vmem:[%s5824_s1 + $0xe0] ss:$8 sps:$4 sm:$0xff]  }
  0x15   :  { %2839 = vmatprep.subr.bf16.mxu0 %v3827_v21  ;;  %v471_v61 = vrot.slane %v449_v59, %v4596_v49  ;;  %v3881_v8 = vld [vmem:[%s5824_s1 + $0x6e4] ss:$8 sps:$4 sm:$0xff]   ;;  %v3884_v10 = vld [vmem:[%s5824_s1 + $0x6e0] ss:$8 sps:$4 sm:$0xff]   ;;  %v3885_v11 = vld [vmem:[%s5824_s1 + $0xf4] ss:$8 sps:$4 sm:$0xff]  }
  0x16   :  { %v499_v3 = vcombine.high %v497_v62, %v497_v62  ;;  %v3887_v12 = vld [vmem:[%s5824_s1 + $0x6f4] ss:$8 sps:$4 sm:$0xff]   ;;  %v3889_v13 = vld [vmem:[%s5824_s1 + $0xf0] ss:$8 sps:$4 sm:$0xff]   ;;  %v3894_v15 = vld [vmem:[%s5824_s1 + $0x104] ss:$8 sps:$4 sm:$0xff]   ;;  %v4681_v18 = vrot.slane %v497_v62, %v4596_v49 }
  0x17   :  { %2594 = vmatpush1.bf16.msra.mxu1 %v3829_v22  ;;  %2615 = vmatprep.mubr.bf16.mxu1 %v471_v61  ;;  %v3890_v14 = vld [vmem:[%s5824_s1 + $0x6f0] ss:$8 sps:$4 sm:$0xff]   ;;  %v3898_v16 = vld [vmem:[%s5824_s1 + $0x704] ss:$8 sps:$4 sm:$0xff]   ;;  %v3892_v19 = vld [vmem:[%s5824_s1 + $0x100] ss:$8 sps:$4 sm:$0xff]  }
  0x18   :  { %2840 = vmatpush1.bf16.msra.mxu0 %v3830_v23  ;;  %2595 = vmatprep.subr.bf16.mxu1 %v3831_v24  ;;  %v527_v4 = vrot.slane %v499_v3, %v4596_v49  ;;  %v3896_v20 = vld [vmem:[%s5824_s1 + $0x700] ss:$8 sps:$4 sm:$0xff]   ;;  %v3901_v21 = vld [vmem:[%s5824_s1 + $0x114] ss:$8 sps:$4 sm:$0xff]   ;;  %v481_v23 = vcombine.high %v471_v61, %v471_v61  ;;  %v3922_v36 = vld [vmem:[%s5824_s1 + $0x744] ss:$8 sps:$4 sm:$0xff]  }
  0x19   :  { %2841 = vmatprep.subr.bf16.mxu0 %v3833_v25  ;;  %v3904_v22 = vld [vmem:[%s5824_s1 + $0x714] ss:$8 sps:$4 sm:$0xff]   ;;  %v3899_v25 = vld [vmem:[%s5824_s1 + $0x110] ss:$8 sps:$4 sm:$0xff]   ;;  %v3917_v37 = vld [vmem:[%s5824_s1 + $0x140] ss:$8 sps:$4 sm:$0xff]  }
  0x1a   :  { %2861 = vmatprep.mubr.bf16.mxu0 %v527_v4  ;;  %v531_v24 = vcombine.high %v527_v4, %v527_v4  ;;  %v3920_v38 = vld [vmem:[%s5824_s1 + $0x740] ss:$8 sps:$4 sm:$0xff]   ;;  %v3926_v43 = vld [vmem:[%s5824_s1 + $0x750] ss:$8 sps:$4 sm:$0xff]   ;;  %v3943_v54 = vld [vmem:[%s5824_s1 + $0x184] ss:$8 sps:$4 sm:$0xff]  }
  0x1b   :  { %2596 = vmatpush1.bf16.msra.mxu1 %v3835_v26  ;;  %v3902_v26 = vld [vmem:[%s5824_s1 + $0x710] ss:$8 sps:$4 sm:$0xff]   ;;  %v3941_v56 = vld [vmem:[%s5824_s1 + $0x180] ss:$8 sps:$4 sm:$0xff]   ;;  %v3952_v59 = vld [vmem:[%s5824_s1 + $0x794] ss:$8 sps:$4 sm:$0xff]  }
  0x1c   :  { %2842 = vmatpush1.bf16.msra.mxu0 %v3836_v27  ;;  %2597 = vmatprep.subr.bf16.mxu1 %v3837_v28  ;;  %v3907_v27 = vld [vmem:[%s5824_s1 + $0x124] ss:$8 sps:$4 sm:$0xff]   ;;  %v3947_v60 = vld [vmem:[%s5824_s1 + $0x190] ss:$8 sps:$4 sm:$0xff]   ;;  %v3964_v3 = vld [vmem:[%s5824_s1 + $0x7b4] ss:$8 sps:$4 sm:$0xff]  }
  0x1d   :  { %2843 = vmatprep.subr.bf16.mxu0 %v3839_v29  ;;  %v3910_v28 = vld [vmem:[%s5824_s1 + $0x724] ss:$8 sps:$4 sm:$0xff]   ;;  %v3905_v29 = vld [vmem:[%s5824_s1 + $0x120] ss:$8 sps:$4 sm:$0xff]   ;;  %v3950_v61 = vld [vmem:[%s5824_s1 + $0x790] ss:$8 sps:$4 sm:$0xff]  }
  0x1e   :  { %v3955_v62 = vld [vmem:[%s5824_s1 + $0x1a4] ss:$8 sps:$4 sm:$0xff]   ;;  %v3959_v4 = vld [vmem:[%s5824_s1 + $0x1b0] ss:$8 sps:$4 sm:$0xff]  }
  0x1f   :  { %2598 = vmatpush1.bf16.msra.mxu1 %v3841_v30  ;;  %v3908_v30 = vld [vmem:[%s5824_s1 + $0x720] ss:$8 sps:$4 sm:$0xff]  }
  0x20   :  { %2844 = vmatpush1.bf16.msra.mxu0 %v3842_v31  ;;  %2599 = vmatprep.subr.bf16.mxu1 %v3843_v32  ;;  %v3913_v31 = vld [vmem:[%s5824_s1 + $0x134] ss:$8 sps:$4 sm:$0xff]  }
  0x21   :  { %2845 = vmatprep.subr.bf16.mxu0 %v3845_v33  ;;  %v3916_v32 = vld [vmem:[%s5824_s1 + $0x734] ss:$8 sps:$4 sm:$0xff]   ;;  %v3911_v33 = vld [vmem:[%s5824_s1 + $0x130] ss:$8 sps:$4 sm:$0xff]  }
  0x23   :  { %2600 = vmatpush1.bf16.msra.mxu1 %v3847_v34  ;;  %v3914_v34 = vld [vmem:[%s5824_s1 + $0x730] ss:$8 sps:$4 sm:$0xff]  }
  0x24   :  { %2846 = vmatpush1.bf16.msra.mxu0 %v3848_v35  ;;  %2601 = vmatprep.subr.bf16.mxu1 %v3849_v39  ;;  %v3919_v35 = vld [vmem:[%s5824_s1 + $0x144] ss:$8 sps:$4 sm:$0xff]   ;;  %v3925_v39 = vld [vmem:[%s5824_s1 + $0x154] ss:$8 sps:$4 sm:$0xff]  }
  0x25   :  { %2847 = vmatprep.subr.bf16.mxu0 %v3851_v40  ;;  %v3928_v40 = vld [vmem:[%s5824_s1 + $0x754] ss:$8 sps:$4 sm:$0xff]  }
  0x27   :  { %2602 = vmatpush1.bf16.msra.mxu1 %v3853_v41  ;;  %v3923_v41 = vld [vmem:[%s5824_s1 + $0x150] ss:$8 sps:$4 sm:$0xff]  }
  0x28   :  { %2848 = vmatpush1.bf16.msra.mxu0 %v3854_v44  ;;  %2603 = vmatprep.subr.bf16.mxu1 %v3855_v45  ;;  %v3931_v44 = vld [vmem:[%s5824_s1 + $0x164] ss:$8 sps:$4 sm:$0xff]  }
  0x29   :  { %2849 = vmatprep.subr.bf16.mxu0 %v3857_v46  ;;  %v3934_v45 = vld [vmem:[%s5824_s1 + $0x764] ss:$8 sps:$4 sm:$0xff]   ;;  %v3929_v46 = vld [vmem:[%s5824_s1 + $0x160] ss:$8 sps:$4 sm:$0xff]  }
  0x2b   :  { %2604 = vmatpush1.bf16.msra.mxu1 %v3859_v47  ;;  %v3932_v47 = vld [vmem:[%s5824_s1 + $0x760] ss:$8 sps:$4 sm:$0xff]  }
  0x2c   :  { %2850 = vmatpush1.bf16.msra.mxu0 %v3860_v48  ;;  %2605 = vmatprep.subr.bf16.mxu1 %v3861_v50  ;;  %v3937_v48 = vld [vmem:[%s5824_s1 + $0x174] ss:$8 sps:$4 sm:$0xff]  }
  0x2d   :  { %2851 = vmatprep.subr.bf16.mxu0 %v3863_v51  ;;  %v3940_v50 = vld [vmem:[%s5824_s1 + $0x774] ss:$8 sps:$4 sm:$0xff]   ;;  %v3935_v51 = vld [vmem:[%s5824_s1 + $0x170] ss:$8 sps:$4 sm:$0xff]  }
  0x2f   :  { %2606 = vmatpush1.bf16.msra.mxu1 %v3865_v53  ;;  %v3938_v53 = vld [vmem:[%s5824_s1 + $0x770] ss:$8 sps:$4 sm:$0xff]  }
  0x30   :  { %2852 = vmatpush1.bf16.msra.mxu0 %v3866_v55  ;;  %2607 = vmatprep.subr.bf16.mxu1 %v3867_v57  ;;  %v3946_v55 = vld [vmem:[%s5824_s1 + $0x784] ss:$8 sps:$4 sm:$0xff]   ;;  %v3944_v57 = vld [vmem:[%s5824_s1 + $0x780] ss:$8 sps:$4 sm:$0xff]  }
  0x31   :  { %2853 = vmatprep.subr.bf16.mxu0 %v3869_v58  ;;  %v3949_v58 = vld [vmem:[%s5824_s1 + $0x194] ss:$8 sps:$4 sm:$0xff]  }
  0x33   :  { %2608 = vmatpush1.bf16.msra.mxu1 %v3871_v63  ;;  %v3958_v63 = vld [vmem:[%s5824_s1 + $0x7a4] ss:$8 sps:$4 sm:$0xff]  }
  0x34   :  { %2854 = vmatpush1.bf16.msra.mxu0 %v3872_v0  ;;  %2609 = vmatprep.subr.bf16.mxu1 %v3873_v1  ;;  %v3953_v0 = vld [vmem:[%s5824_s1 + $0x1a0] ss:$8 sps:$4 sm:$0xff]  }
  0x35   :  { %2855 = vmatprep.subr.bf16.mxu0 %v3875_v2  ;;  %v3956_v1 = vld [vmem:[%s5824_s1 + $0x7a0] ss:$8 sps:$4 sm:$0xff]   ;;  %v3961_v2 = vld [vmem:[%s5824_s1 + $0x1b4] ss:$8 sps:$4 sm:$0xff]  }
  0x37   :  { %2610 = vmatpush1.bf16.msra.mxu1 %v3877_v5  ;;  %v3962_v5 = vld [vmem:[%s5824_s1 + $0x7b0] ss:$8 sps:$4 sm:$0xff]  }
  0x38   :  { %2856 = vmatpush1.bf16.msra.mxu0 %v3878_v6  ;;  %2611 = vmatprep.subr.bf16.mxu1 %v3879_v7  ;;  %v3967_v6 = vld [vmem:[%s5824_s1 + $0x1c4] ss:$8 sps:$4 sm:$0xff]  }
  0x39   :  { %2857 = vmatprep.subr.bf16.mxu0 %v3881_v8  ;;  %v3970_v7 = vld [vmem:[%s5824_s1 + $0x7c4] ss:$8 sps:$4 sm:$0xff]   ;;  %v3965_v8 = vld [vmem:[%s5824_s1 + $0x1c0] ss:$8 sps:$4 sm:$0xff]  }
  0x3b   :  { %2612 = vmatpush1.bf16.msra.mxu1 %v3883_v9  ;;  %v3968_v9 = vld [vmem:[%s5824_s1 + $0x7c0] ss:$8 sps:$4 sm:$0xff]  }
  0x3c   :  { %2858 = vmatpush1.bf16.msra.mxu0 %v3884_v10  ;;  %2613 = vmatprep.subr.bf16.mxu1 %v3885_v11  ;;  %v3973_v10 = vld [vmem:[%s5824_s1 + $0x1d4] ss:$8 sps:$4 sm:$0xff]  }
  0x3d   :  { %2859 = vmatprep.subr.bf16.mxu0 %v3887_v12  ;;  %v3976_v11 = vld [vmem:[%s5824_s1 + $0x7d4] ss:$8 sps:$4 sm:$0xff]   ;;  %v3971_v12 = vld [vmem:[%s5824_s1 + $0x1d0] ss:$8 sps:$4 sm:$0xff]  }
  0x3f   :  { %2614 = vmatpush1.bf16.msra.mxu1 %v3889_v13  ;;  %v3974_v13 = vld [vmem:[%s5824_s1 + $0x7d0] ss:$8 sps:$4 sm:$0xff]  }
  0x40   :  { %2860 = vmatpush1.bf16.msra.mxu0 %v3890_v14  ;;  %2624 = vmatprep.subr.bf16.mxu1 %v3894_v15  ;;  %v3979_v14 = vld [vmem:[%s5824_s1 + $0x1e4] ss:$8 sps:$4 sm:$0xff]  }
  0x41   :  { %2870 = vmatprep.subr.bf16.mxu0 %v3898_v16  ;;  %v3982_v15 = vld [vmem:[%s5824_s1 + $0x7e4] ss:$8 sps:$4 sm:$0xff]   ;;  %v434_v16 = vcombine.high %v4607_v52, %v4607_v52  ;;  %v3988_v52 = vld [vmem:[%s5824_s1 + $0x7f4] ss:$8 sps:$4 sm:$0xff]  }
  0x42   :  { %2616 = vmatmul.mubr.bf16.vlgmr.msra.gmra.mrb[0].mxu1 %v4678_v17 }
  0x43   :  { %2862 = vmatmul.mubr.bf16.vlgmr.msra.gmra.mrb[0].mxu0 %v4681_v18  ;;  %2625 = vmatpush1.bf16.msra.mxu1 %v3892_v19  ;;  %v3977_v19 = vld [vmem:[%s5824_s1 + $0x1e0] ss:$8 sps:$4 sm:$0xff]  }
  0x44   :  { %2871 = vmatpush1.bf16.msra.mxu0 %v3896_v20  ;;  %2626 = vmatprep.subr.bf16.mxu1 %v3901_v21  ;;  %v3980_v20 = vld [vmem:[%s5824_s1 + $0x7e0] ss:$8 sps:$4 sm:$0xff]   ;;  %v3985_v21 = vld [vmem:[%s5824_s1 + $0x1f4] ss:$8 sps:$4 sm:$0xff]  }
  0x45   :  { %2872 = vmatprep.subr.bf16.mxu0 %v3904_v22  ;;  %2656 = vmatprep.mubr.bf16.mxu1 %v481_v23  ;;  %v4868_v22 = vrot.slane %v434_v16, %v4596_v49  ;;  %v3983_v23 = vld [vmem:[%s5824_s1 + $0x1f0] ss:$8 sps:$4 sm:$0xff]  }
  0x46   :  { %2902 = vmatprep.mubr.bf16.mxu0 %v531_v24  ;;  %v3986_v24 = vld [vmem:[%s5824_s1 + $0x7f0] ss:$8 sps:$4 sm:$0xff]  }
  0x47   :  { %2627 = vmatpush1.bf16.msra.mxu1 %v3899_v25  ;;  %v3991_v25 = vld [vmem:[%s5824_s1 + $0x204] ss:$8 sps:$4 sm:$0xff]   ;;  %v4055_v16 = vld [vmem:[%s5824_s1 + $0x2b0] ss:$8 sps:$4 sm:$0xff]  }
  0x48   :  { %2873 = vmatpush1.bf16.msra.mxu0 %v3902_v26  ;;  %2628 = vmatprep.subr.bf16.mxu1 %v3907_v27  ;;  %v3994_v26 = vld [vmem:[%s5824_s1 + $0x804] ss:$8 sps:$4 sm:$0xff]   ;;  %v450_v27 = vcombine.high %v4868_v22, %v4868_v22 }
  0x49   :  { %2874 = vmatprep.subr.bf16.mxu0 %v3910_v28  ;;  %v479_v28 = vcombine.high %v4678_v17, %v4678_v17  ;;  %v4000_v17 = vld [vmem:[%s5824_s1 + $0x814] ss:$8 sps:$4 sm:$0xff]  }
  0x4b   :  { %2629 = vmatpush1.bf16.msra.mxu1 %v3905_v29  ;;  %v529_v29 = vcombine.high %v4681_v18, %v4681_v18  ;;  %v4901_v18 = vrot.slane %v450_v27, %v4596_v49  ;;  %v4070_v27 = vld [vmem:[%s5824_s1 + $0x8d0] ss:$8 sps:$4 sm:$0xff]  }
  0x4c   :  { %2875 = vmatpush1.bf16.msra.mxu0 %v3908_v30  ;;  %2630 = vmatprep.subr.bf16.mxu1 %v3913_v31  ;;  %v3989_v30 = vld [vmem:[%s5824_s1 + $0x200] ss:$8 sps:$4 sm:$0xff]  }
  0x4d   :  { %2876 = vmatprep.subr.bf16.mxu0 %v3916_v32  ;;  %v3992_v31 = vld [vmem:[%s5824_s1 + $0x800] ss:$8 sps:$4 sm:$0xff]   ;;  %v3997_v32 = vld [vmem:[%s5824_s1 + $0x214] ss:$8 sps:$4 sm:$0xff]  }
  0x4f   :  { %2631 = vmatpush1.bf16.msra.mxu1 %v3911_v33  ;;  %v4906_v33 = vld [vmem:[%s5823_s0 + $0x10] sm:$0xff] }
  0x50   :  { %2877 = vmatpush1.bf16.msra.mxu0 %v3914_v34  ;;  %2632 = vmatprep.subr.bf16.mxu1 %v3919_v35  ;;  %v3995_v34 = vld [vmem:[%s5824_s1 + $0x210] ss:$8 sps:$4 sm:$0xff]   ;;  %v4913_v35 = vrot.slane %v4906_v33, %v4596_v49 }
  0x51   :  { %2878 = vmatprep.subr.bf16.mxu0 %v3922_v36  ;;  %v3998_v36 = vld [vmem:[%s5824_s1 + $0x810] ss:$8 sps:$4 sm:$0xff]  }
  0x53   :  { %2633 = vmatpush1.bf16.msra.mxu1 %v3917_v37  ;;  %v4003_v37 = vld [vmem:[%s5824_s1 + $0x224] ss:$8 sps:$4 sm:$0xff]  }
  0x54   :  { %2879 = vmatpush1.bf16.msra.mxu0 %v3920_v38  ;;  %2634 = vmatprep.subr.bf16.mxu1 %v3925_v39  ;;  %v4006_v38 = vld [vmem:[%s5824_s1 + $0x824] ss:$8 sps:$4 sm:$0xff]   ;;  %v547_v39 = vcombine.high %v4913_v35, %v4913_v35 }
  0x55   :  { %2880 = vmatprep.subr.bf16.mxu0 %v3928_v40  ;;  %v4001_v40 = vld [vmem:[%s5824_s1 + $0x220] ss:$8 sps:$4 sm:$0xff]  }
  0x57   :  { %2635 = vmatpush1.bf16.msra.mxu1 %v3923_v41  ;;  %v4931_v41 = vrot.slane %v547_v39, %v4596_v49  ;;  %v4085_v39 = vld [vmem:[%s5824_s1 + $0x300] ss:$8 sps:$4 sm:$0xff]  }
  0x58   :  { %2881 = vmatpush1.bf16.msra.mxu0 %v3926_v43  ;;  %2636 = vmatprep.subr.bf16.mxu1 %v3931_v44  ;;  %v4004_v43 = vld [vmem:[%s5824_s1 + $0x820] ss:$8 sps:$4 sm:$0xff]   ;;  %v4009_v44 = vld [vmem:[%s5824_s1 + $0x234] ss:$8 sps:$4 sm:$0xff]  }
  0x59   :  { %2882 = vmatprep.subr.bf16.mxu0 %v3934_v45  ;;  %v4012_v45 = vld [vmem:[%s5824_s1 + $0x834] ss:$8 sps:$4 sm:$0xff]  }
  0x5b   :  { %2637 = vmatpush1.bf16.msra.mxu1 %v3929_v46  ;;  %v4007_v46 = vld [vmem:[%s5824_s1 + $0x230] ss:$8 sps:$4 sm:$0xff]  }
  0x5c   :  { %2883 = vmatpush1.bf16.msra.mxu0 %v3932_v47  ;;  %2638 = vmatprep.subr.bf16.mxu1 %v3937_v48  ;;  %v4010_v47 = vld [vmem:[%s5824_s1 + $0x830] ss:$8 sps:$4 sm:$0xff]   ;;  %v4015_v48 = vld [vmem:[%s5824_s1 + $0x244] ss:$8 sps:$4 sm:$0xff]  }
  0x5d   :  { %2884 = vmatprep.subr.bf16.mxu0 %v3940_v50  ;;  %v4018_v50 = vld [vmem:[%s5824_s1 + $0x844] ss:$8 sps:$4 sm:$0xff]  }
  0x5f   :  { %2639 = vmatpush1.bf16.msra.mxu1 %v3935_v51  ;;  %v4013_v51 = vld [vmem:[%s5824_s1 + $0x240] ss:$8 sps:$4 sm:$0xff]  }
  0x60   :  { %2885 = vmatpush1.bf16.msra.mxu0 %v3938_v53  ;;  %2640 = vmatprep.subr.bf16.mxu1 %v3943_v54  ;;  %v4016_v53 = vld [vmem:[%s5824_s1 + $0x840] ss:$8 sps:$4 sm:$0xff]   ;;  %v4021_v54 = vld [vmem:[%s5824_s1 + $0x254] ss:$8 sps:$4 sm:$0xff]  }
  0x61   :  { %2886 = vmatprep.subr.bf16.mxu0 %v3946_v55  ;;  %v4024_v55 = vld [vmem:[%s5824_s1 + $0x854] ss:$8 sps:$4 sm:$0xff]  }
  0x63   :  { %2641 = vmatpush1.bf16.msra.mxu1 %v3941_v56  ;;  %v4019_v56 = vld [vmem:[%s5824_s1 + $0x250] ss:$8 sps:$4 sm:$0xff]  }
  0x64   :  { %2887 = vmatpush1.bf16.msra.mxu0 %v3944_v57  ;;  %2642 = vmatprep.subr.bf16.mxu1 %v3949_v58  ;;  %v4022_v57 = vld [vmem:[%s5824_s1 + $0x850] ss:$8 sps:$4 sm:$0xff]   ;;  %v4027_v58 = vld [vmem:[%s5824_s1 + $0x264] ss:$8 sps:$4 sm:$0xff]  }
  0x65   :  { %2888 = vmatprep.subr.bf16.mxu0 %v3952_v59  ;;  %v4030_v59 = vld [vmem:[%s5824_s1 + $0x864] ss:$8 sps:$4 sm:$0xff]  }
  0x67   :  { %2643 = vmatpush1.bf16.msra.mxu1 %v3947_v60  ;;  %v4025_v60 = vld [vmem:[%s5824_s1 + $0x260] ss:$8 sps:$4 sm:$0xff]  }
  0x68   :  { %2889 = vmatpush1.bf16.msra.mxu0 %v3950_v61  ;;  %2644 = vmatprep.subr.bf16.mxu1 %v3955_v62  ;;  %v4028_v61 = vld [vmem:[%s5824_s1 + $0x860] ss:$8 sps:$4 sm:$0xff]   ;;  %v4033_v62 = vld [vmem:[%s5824_s1 + $0x274] ss:$8 sps:$4 sm:$0xff]  }
  0x69   :  { %2890 = vmatprep.subr.bf16.mxu0 %v3958_v63  ;;  %v4036_v63 = vld [vmem:[%s5824_s1 + $0x874] ss:$8 sps:$4 sm:$0xff]  }
  0x6b   :  { %2645 = vmatpush1.bf16.msra.mxu1 %v3953_v0  ;;  %v4031_v0 = vld [vmem:[%s5824_s1 + $0x270] ss:$8 sps:$4 sm:$0xff]  }
  0x6c   :  { %2891 = vmatpush1.bf16.msra.mxu0 %v3956_v1  ;;  %2646 = vmatprep.subr.bf16.mxu1 %v3961_v2  ;;  %v4034_v1 = vld [vmem:[%s5824_s1 + $0x870] ss:$8 sps:$4 sm:$0xff]   ;;  %v4039_v2 = vld [vmem:[%s5824_s1 + $0x284] ss:$8 sps:$4 sm:$0xff]  }
  0x6d   :  { %2892 = vmatprep.subr.bf16.mxu0 %v3964_v3  ;;  %v4042_v3 = vld [vmem:[%s5824_s1 + $0x884] ss:$8 sps:$4 sm:$0xff]  }
  0x6f   :  { %2647 = vmatpush1.bf16.msra.mxu1 %v3959_v4  ;;  %v4037_v4 = vld [vmem:[%s5824_s1 + $0x280] ss:$8 sps:$4 sm:$0xff]  }
  0x70   :  { %2893 = vmatpush1.bf16.msra.mxu0 %v3962_v5  ;;  %2648 = vmatprep.subr.bf16.mxu1 %v3967_v6  ;;  %v4040_v5 = vld [vmem:[%s5824_s1 + $0x880] ss:$8 sps:$4 sm:$0xff]   ;;  %v4045_v6 = vld [vmem:[%s5824_s1 + $0x294] ss:$8 sps:$4 sm:$0xff]  }
  0x71   :  { %2894 = vmatprep.subr.bf16.mxu0 %v3970_v7  ;;  %v4048_v7 = vld [vmem:[%s5824_s1 + $0x894] ss:$8 sps:$4 sm:$0xff]  }
  0x73   :  { %2649 = vmatpush1.bf16.msra.mxu1 %v3965_v8  ;;  %v4043_v8 = vld [vmem:[%s5824_s1 + $0x290] ss:$8 sps:$4 sm:$0xff]  }
  0x74   :  { %2895 = vmatpush1.bf16.msra.mxu0 %v3968_v9  ;;  %2650 = vmatprep.subr.bf16.mxu1 %v3973_v10  ;;  %v4046_v9 = vld [vmem:[%s5824_s1 + $0x890] ss:$8 sps:$4 sm:$0xff]   ;;  %v4051_v10 = vld [vmem:[%s5824_s1 + $0x2a4] ss:$8 sps:$4 sm:$0xff]  }
  0x75   :  { %2896 = vmatprep.subr.bf16.mxu0 %v3976_v11  ;;  %v4054_v11 = vld [vmem:[%s5824_s1 + $0x8a4] ss:$8 sps:$4 sm:$0xff]  }
  0x77   :  { %2651 = vmatpush1.bf16.msra.mxu1 %v3971_v12  ;;  %v4049_v12 = vld [vmem:[%s5824_s1 + $0x2a0] ss:$8 sps:$4 sm:$0xff]  }
  0x78   :  { %2897 = vmatpush1.bf16.msra.mxu0 %v3974_v13  ;;  %2652 = vmatprep.subr.bf16.mxu1 %v3979_v14  ;;  %v4052_v13 = vld [vmem:[%s5824_s1 + $0x8a0] ss:$8 sps:$4 sm:$0xff]   ;;  %v4057_v14 = vld [vmem:[%s5824_s1 + $0x2b4] ss:$8 sps:$4 sm:$0xff]  }
  0x79   :  { %2898 = vmatprep.subr.bf16.mxu0 %v3982_v15  ;;  %v4060_v15 = vld [vmem:[%s5824_s1 + $0x8b4] ss:$8 sps:$4 sm:$0xff]  }
  0x7b   :  { %2653 = vmatpush1.bf16.msra.mxu1 %v3977_v19  ;;  %v4058_v19 = vld [vmem:[%s5824_s1 + $0x8b0] ss:$8 sps:$4 sm:$0xff]  }
  0x7c   :  { %2899 = vmatpush1.bf16.msra.mxu0 %v3980_v20  ;;  %2654 = vmatprep.subr.bf16.mxu1 %v3985_v21  ;;  %v4063_v20 = vld [vmem:[%s5824_s1 + $0x2c4] ss:$8 sps:$4 sm:$0xff]  }
  0x7d   :  { %2900 = vmatprep.subr.bf16.mxu0 %v3988_v52  ;;  %v4066_v21 = vld [vmem:[%s5824_s1 + $0x8c4] ss:$8 sps:$4 sm:$0xff]   ;;  %v4061_v52 = vld [vmem:[%s5824_s1 + $0x2c0] ss:$8 sps:$4 sm:$0xff]  }
  0x7f   :  { %2655 = vmatpush1.bf16.msra.mxu1 %v3983_v23  ;;  %v4064_v23 = vld [vmem:[%s5824_s1 + $0x8c0] ss:$8 sps:$4 sm:$0xff]  }
  0x80   :  { %2901 = vmatpush1.bf16.msra.mxu0 %v3986_v24  ;;  %2665 = vmatprep.subr.bf16.mxu1 %v3991_v25  ;;  %v4069_v24 = vld [vmem:[%s5824_s1 + $0x2d4] ss:$8 sps:$4 sm:$0xff]  }
  0x81   :  { %2911 = vmatprep.subr.bf16.mxu0 %v3994_v26  ;;  %v4072_v25 = vld [vmem:[%s5824_s1 + $0x8d4] ss:$8 sps:$4 sm:$0xff]   ;;  %v4067_v26 = vld [vmem:[%s5824_s1 + $0x2d0] ss:$8 sps:$4 sm:$0xff]  }
  0x82   :  { %2657 = vmatmul.mubr.bf16.vlgmr.msra.gmra.mrb[0].mxu1 %v479_v28  ;;  %v4075_v28 = vld [vmem:[%s5824_s1 + $0x2e4] ss:$8 sps:$4 sm:$0xff]  }
  0x83   :  { %2903 = vmatmul.mubr.bf16.vlgmr.msra.gmra.mrb[0].mxu0 %v529_v29  ;;  %2666 = vmatpush1.bf16.msra.mxu1 %v3989_v30  ;;  %v4078_v29 = vld [vmem:[%s5824_s1 + $0x8e4] ss:$8 sps:$4 sm:$0xff]   ;;  %v4073_v30 = vld [vmem:[%s5824_s1 + $0x2e0] ss:$8 sps:$4 sm:$0xff]  }
  0x84   :  { %2912 = vmatpush1.bf16.msra.mxu0 %v3992_v31  ;;  %2667 = vmatprep.subr.bf16.mxu1 %v3997_v32  ;;  %v4076_v31 = vld [vmem:[%s5824_s1 + $0x8e0] ss:$8 sps:$4 sm:$0xff]   ;;  %v4081_v32 = vld [vmem:[%s5824_s1 + $0x2f4] ss:$8 sps:$4 sm:$0xff]  }
  0x85   :  { %2913 = vmatprep.subr.bf16.mxu0 %v4000_v17  ;;  %2697 = vmatprep.mubr.bf16.mxu1 %v4901_v18  ;;  %v4084_v17 = vld [vmem:[%s5824_s1 + $0x8f4] ss:$8 sps:$4 sm:$0xff]  }
  0x86   :  { %2943 = vmatprep.mubr.bf16.mxu0 %v4931_v41 }
  0x87   :  { %2668 = vmatpush1.bf16.msra.mxu1 %v3995_v34  ;;  %v4079_v34 = vld [vmem:[%s5824_s1 + $0x2f0] ss:$8 sps:$4 sm:$0xff]  }
  0x88   :  { %2914 = vmatpush1.bf16.msra.mxu0 %v3998_v36  ;;  %2669 = vmatprep.subr.bf16.mxu1 %v4003_v37  ;;  %v4082_v36 = vld [vmem:[%s5824_s1 + $0x8f0] ss:$8 sps:$4 sm:$0xff]   ;;  %v4087_v37 = vld [vmem:[%s5824_s1 + $0x304] ss:$8 sps:$4 sm:$0xff]  }
  0x89   :  { %2915 = vmatprep.subr.bf16.mxu0 %v4006_v38  ;;  %v4090_v38 = vld [vmem:[%s5824_s1 + $0x904] ss:$8 sps:$4 sm:$0xff]  }
  0x8b   :  { %2670 = vmatpush1.bf16.msra.mxu1 %v4001_v40  ;;  %v5104_v40 = vrot.slane %v4868_v22, %v4596_v49  ;;  %v4096_v22 = vld [vmem:[%s5824_s1 + $0x914] ss:$8 sps:$4 sm:$0xff]  }
  0x8c   :  { %2916 = vmatpush1.bf16.msra.mxu0 %v4004_v43  ;;  %2671 = vmatprep.subr.bf16.mxu1 %v4009_v44  ;;  %v5108_v43 = vrot.slane %v4913_v35, %v4596_v49  ;;  %v4088_v44 = vld [vmem:[%s5824_s1 + $0x900] ss:$8 sps:$4 sm:$0xff]   ;;  %v482_v35 = vcombine.high %v4901_v18, %v4901_v18  ;;  %v4099_v18 = vld [vmem:[%s5824_s1 + $0x324] ss:$8 sps:$4 sm:$0xff]  }
  0x8d   :  { %2917 = vmatprep.subr.bf16.mxu0 %v4012_v45  ;;  %v4093_v45 = vld [vmem:[%s5824_s1 + $0x314] ss:$8 sps:$4 sm:$0xff]  }
  0x8f   :  { %2672 = vmatpush1.bf16.msra.mxu1 %v4007_v46  ;;  %v579_v46 = vcombine.high %v4931_v41, %v4931_v41  ;;  %v4102_v41 = vld [vmem:[%s5824_s1 + $0x924] ss:$8 sps:$4 sm:$0xff]  }
  0x90   :  { %2918 = vmatpush1.bf16.msra.mxu0 %v4010_v47  ;;  %2673 = vmatprep.subr.bf16.mxu1 %v4015_v48  ;;  %v4091_v47 = vld [vmem:[%s5824_s1 + $0x310] ss:$8 sps:$4 sm:$0xff]  }
  0x91   :  { %2919 = vmatprep.subr.bf16.mxu0 %v4018_v50  ;;  %v4094_v48 = vld [vmem:[%s5824_s1 + $0x910] ss:$8 sps:$4 sm:$0xff]   ;;  %v4097_v50 = vld [vmem:[%s5824_s1 + $0x320] ss:$8 sps:$4 sm:$0xff]  }
  0x93   :  { %2674 = vmatpush1.bf16.msra.mxu1 %v4013_v51  ;;  %v4100_v51 = vld [vmem:[%s5824_s1 + $0x920] ss:$8 sps:$4 sm:$0xff]  }
  0x94   :  { %2920 = vmatpush1.bf16.msra.mxu0 %v4016_v53  ;;  %2675 = vmatprep.subr.bf16.mxu1 %v4021_v54  ;;  %v4105_v53 = vld [vmem:[%s5824_s1 + $0x334] ss:$8 sps:$4 sm:$0xff]  }
  0x95   :  { %2921 = vmatprep.subr.bf16.mxu0 %v4024_v55  ;;  %v4108_v54 = vld [vmem:[%s5824_s1 + $0x934] ss:$8 sps:$4 sm:$0xff]   ;;  %v4103_v55 = vld [vmem:[%s5824_s1 + $0x330] ss:$8 sps:$4 sm:$0xff]  }
  0x97   :  { %2676 = vmatpush1.bf16.msra.mxu1 %v4019_v56  ;;  %v4106_v56 = vld [vmem:[%s5824_s1 + $0x930] ss:$8 sps:$4 sm:$0xff]  }
  0x98   :  { %2922 = vmatpush1.bf16.msra.mxu0 %v4022_v57  ;;  %2677 = vmatprep.subr.bf16.mxu1 %v4027_v58  ;;  %v4111_v57 = vld [vmem:[%s5824_s1 + $0x344] ss:$8 sps:$4 sm:$0xff]  }
  0x99   :  { %2923 = vmatprep.subr.bf16.mxu0 %v4030_v59  ;;  %v4114_v58 = vld [vmem:[%s5824_s1 + $0x944] ss:$8 sps:$4 sm:$0xff]   ;;  %v4109_v59 = vld [vmem:[%s5824_s1 + $0x340] ss:$8 sps:$4 sm:$0xff]  }
  0x9b   :  { %2678 = vmatpush1.bf16.msra.mxu1 %v4025_v60  ;;  %v4112_v60 = vld [vmem:[%s5824_s1 + $0x940] ss:$8 sps:$4 sm:$0xff]  }
  0x9c   :  { %2924 = vmatpush1.bf16.msra.mxu0 %v4028_v61  ;;  %2679 = vmatprep.subr.bf16.mxu1 %v4033_v62  ;;  %v4117_v61 = vld [vmem:[%s5824_s1 + $0x354] ss:$8 sps:$4 sm:$0xff]  }
  0x9d   :  { %2925 = vmatprep.subr.bf16.mxu0 %v4036_v63  ;;  %v4120_v62 = vld [vmem:[%s5824_s1 + $0x954] ss:$8 sps:$4 sm:$0xff]   ;;  %v4115_v63 = vld [vmem:[%s5824_s1 + $0x350] ss:$8 sps:$4 sm:$0xff]  }
  0x9f   :  { %2680 = vmatpush1.bf16.msra.mxu1 %v4031_v0  ;;  %v4118_v0 = vld [vmem:[%s5824_s1 + $0x950] ss:$8 sps:$4 sm:$0xff]  }
  0xa0   :  { %2926 = vmatpush1.bf16.msra.mxu0 %v4034_v1  ;;  %2681 = vmatprep.subr.bf16.mxu1 %v4039_v2  ;;  %v4123_v1 = vld [vmem:[%s5824_s1 + $0x364] ss:$8 sps:$4 sm:$0xff]  }
  0xa1   :  { %2927 = vmatprep.subr.bf16.mxu0 %v4042_v3  ;;  %v4126_v2 = vld [vmem:[%s5824_s1 + $0x964] ss:$8 sps:$4 sm:$0xff]   ;;  %v4121_v3 = vld [vmem:[%s5824_s1 + $0x360] ss:$8 sps:$4 sm:$0xff]  }
  0xa3   :  { %2682 = vmatpush1.bf16.msra.mxu1 %v4037_v4  ;;  %v4124_v4 = vld [vmem:[%s5824_s1 + $0x960] ss:$8 sps:$4 sm:$0xff]  }
  0xa4   :  { %2928 = vmatpush1.bf16.msra.mxu0 %v4040_v5  ;;  %2683 = vmatprep.subr.bf16.mxu1 %v4045_v6  ;;  %v4129_v5 = vld [vmem:[%s5824_s1 + $0x374] ss:$8 sps:$4 sm:$0xff]  }
  0xa5   :  { %2929 = vmatprep.subr.bf16.mxu0 %v4048_v7  ;;  %v4132_v6 = vld [vmem:[%s5824_s1 + $0x974] ss:$8 sps:$4 sm:$0xff]   ;;  %v4127_v7 = vld [vmem:[%s5824_s1 + $0x370] ss:$8 sps:$4 sm:$0xff]  }
  0xa7   :  { %2684 = vmatpush1.bf16.msra.mxu1 %v4043_v8  ;;  %v4130_v8 = vld [vmem:[%s5824_s1 + $0x970] ss:$8 sps:$4 sm:$0xff]  }
  0xa8   :  { %2930 = vmatpush1.bf16.msra.mxu0 %v4046_v9  ;;  %2685 = vmatprep.subr.bf16.mxu1 %v4051_v10  ;;  %v4135_v9 = vld [vmem:[%s5824_s1 + $0x384] ss:$8 sps:$4 sm:$0xff]  }
  0xa9   :  { %2931 = vmatprep.subr.bf16.mxu0 %v4054_v11  ;;  %v4138_v10 = vld [vmem:[%s5824_s1 + $0x984] ss:$8 sps:$4 sm:$0xff]   ;;  %v4133_v11 = vld [vmem:[%s5824_s1 + $0x380] ss:$8 sps:$4 sm:$0xff]  }
  0xab   :  { %2686 = vmatpush1.bf16.msra.mxu1 %v4049_v12  ;;  %v4136_v12 = vld [vmem:[%s5824_s1 + $0x980] ss:$8 sps:$4 sm:$0xff]  }
  0xac   :  { %2932 = vmatpush1.bf16.msra.mxu0 %v4052_v13  ;;  %2687 = vmatprep.subr.bf16.mxu1 %v4057_v14  ;;  %v4141_v13 = vld [vmem:[%s5824_s1 + $0x394] ss:$8 sps:$4 sm:$0xff]  }
  0xad   :  { %2933 = vmatprep.subr.bf16.mxu0 %v4060_v15  ;;  %v4144_v14 = vld [vmem:[%s5824_s1 + $0x994] ss:$8 sps:$4 sm:$0xff]   ;;  %v4139_v15 = vld [vmem:[%s5824_s1 + $0x390] ss:$8 sps:$4 sm:$0xff]  }
  0xaf   :  { %2688 = vmatpush1.bf16.msra.mxu1 %v4055_v16  ;;  %v4142_v16 = vld [vmem:[%s5824_s1 + $0x990] ss:$8 sps:$4 sm:$0xff]  }
  0xb0   :  { %2934 = vmatpush1.bf16.msra.mxu0 %v4058_v19  ;;  %2689 = vmatprep.subr.bf16.mxu1 %v4063_v20  ;;  %v4147_v19 = vld [vmem:[%s5824_s1 + $0x3a4] ss:$8 sps:$4 sm:$0xff]  }
  0xb1   :  { %2935 = vmatprep.subr.bf16.mxu0 %v4066_v21  ;;  %v4150_v20 = vld [vmem:[%s5824_s1 + $0x9a4] ss:$8 sps:$4 sm:$0xff]   ;;  %v4145_v21 = vld [vmem:[%s5824_s1 + $0x3a0] ss:$8 sps:$4 sm:$0xff]  }
  0xb3   :  { %2690 = vmatpush1.bf16.msra.mxu1 %v4061_v52  ;;  %v4148_v52 = vld [vmem:[%s5824_s1 + $0x9a0] ss:$8 sps:$4 sm:$0xff]  }
  0xb4   :  { %2936 = vmatpush1.bf16.msra.mxu0 %v4064_v23  ;;  %2691 = vmatprep.subr.bf16.mxu1 %v4069_v24  ;;  %v4153_v23 = vld [vmem:[%s5824_s1 + $0x3b4] ss:$8 sps:$4 sm:$0xff]  }
  0xb5   :  { %2937 = vmatprep.subr.bf16.mxu0 %v4072_v25  ;;  %v4156_v24 = vld [vmem:[%s5824_s1 + $0x9b4] ss:$8 sps:$4 sm:$0xff]   ;;  %v4151_v25 = vld [vmem:[%s5824_s1 + $0x3b0] ss:$8 sps:$4 sm:$0xff]  }
  0xb7   :  { %2692 = vmatpush1.bf16.msra.mxu1 %v4067_v26  ;;  %v4154_v26 = vld [vmem:[%s5824_s1 + $0x9b0] ss:$8 sps:$4 sm:$0xff]  }
  0xb8   :  { %2938 = vmatpush1.bf16.msra.mxu0 %v4070_v27  ;;  %2693 = vmatprep.subr.bf16.mxu1 %v4075_v28  ;;  %v4159_v27 = vld [vmem:[%s5824_s1 + $0x3c4] ss:$8 sps:$4 sm:$0xff]  }
  0xb9   :  { %2939 = vmatprep.subr.bf16.mxu0 %v4078_v29  ;;  %v4162_v28 = vld [vmem:[%s5824_s1 + $0x9c4] ss:$8 sps:$4 sm:$0xff]   ;;  %v4157_v29 = vld [vmem:[%s5824_s1 + $0x3c0] ss:$8 sps:$4 sm:$0xff]  }
  0xbb   :  { %2694 = vmatpush1.bf16.msra.mxu1 %v4073_v30  ;;  %v4160_v30 = vld [vmem:[%s5824_s1 + $0x9c0] ss:$8 sps:$4 sm:$0xff]  }
  0xbc   :  { %2940 = vmatpush1.bf16.msra.mxu0 %v4076_v31  ;;  %2695 = vmatprep.subr.bf16.mxu1 %v4081_v32  ;;  %v4165_v31 = vld [vmem:[%s5824_s1 + $0x3d4] ss:$8 sps:$4 sm:$0xff]  }
  0xbd   :  { %2941 = vmatprep.subr.bf16.mxu0 %v4084_v17  ;;  %v4168_v32 = vld [vmem:[%s5824_s1 + $0x9d4] ss:$8 sps:$4 sm:$0xff]   ;;  %v4163_v17 = vld [vmem:[%s5824_s1 + $0x3d0] ss:$8 sps:$4 sm:$0xff]  }
  0xbf   :  { %2696 = vmatpush1.bf16.msra.mxu1 %v4079_v34  ;;  %v4166_v34 = vld [vmem:[%s5824_s1 + $0x9d0] ss:$8 sps:$4 sm:$0xff]  }
  0xc0   :  { %2942 = vmatpush1.bf16.msra.mxu0 %v4082_v36  ;;  %2706 = vmatprep.subr.bf16.mxu1 %v4087_v37  ;;  %v4171_v36 = vld [vmem:[%s5824_s1 + $0x3e4] ss:$8 sps:$4 sm:$0xff]  }
  0xc1   :  { %2952 = vmatprep.subr.bf16.mxu0 %v4090_v38  ;;  %v4174_v37 = vld [vmem:[%s5824_s1 + $0x9e4] ss:$8 sps:$4 sm:$0xff]   ;;  %v532_v38 = vcombine.high %v4906_v33, %v4906_v33  ;;  %v4180_v33 = vld [vmem:[%s5824_s1 + $0x9f4] ss:$8 sps:$4 sm:$0xff]  }
  0xc2   :  { %2698 = vmatmul.mubr.bf16.vlgmr.msra.gmra.mrb[0].mxu1 %v5104_v40 }
  0xc3   :  { %2944 = vmatmul.mubr.bf16.vlgmr.msra.gmra.mrb[0].mxu0 %v5108_v43  ;;  %2707 = vmatpush1.bf16.msra.mxu1 %v4085_v39  ;;  %v4169_v39 = vld [vmem:[%s5824_s1 + $0x3e0] ss:$8 sps:$4 sm:$0xff]  }
  0xc4   :  { %2953 = vmatpush1.bf16.msra.mxu0 %v4088_v44  ;;  %2708 = vmatprep.subr.bf16.mxu1 %v4093_v45  ;;  %v4172_v44 = vld [vmem:[%s5824_s1 + $0x9e0] ss:$8 sps:$4 sm:$0xff]   ;;  %v4177_v45 = vld [vmem:[%s5824_s1 + $0x3f4] ss:$8 sps:$4 sm:$0xff]  }
  0xc5   :  { %2954 = vmatprep.subr.bf16.mxu0 %v4096_v22  ;;  %2738 = vmatprep.mubr.bf16.mxu1 %v482_v35  ;;  %v5298_v22 = vld.sshfl [vmem:[%s5823_s0 + $0x8] sm:$0xff pattern:$0x75316420]  ;;  %v5301_v35 = vrot.slane %v532_v38, %v4596_v49 }
  0xc6   :  { %2984 = vmatprep.mubr.bf16.mxu0 %v579_v46  ;;  %v4175_v46 = vld [vmem:[%s5824_s1 + $0x3f0] ss:$8 sps:$4 sm:$0xff]  }
  0xc7   :  { %2709 = vmatpush1.bf16.msra.mxu1 %v4091_v47  ;;  %v4178_v47 = vld [vmem:[%s5824_s1 + $0x9f0] ss:$8 sps:$4 sm:$0xff]  }
  0xc8   :  { %2955 = vmatpush1.bf16.msra.mxu0 %v4094_v48  ;;  %2710 = vmatprep.subr.bf16.mxu1 %v4099_v18  ;;  %v4183_v48 = vld [vmem:[%s5824_s1 + $0x404] ss:$8 sps:$4 sm:$0xff]  }
  0xc9   :  { %2956 = vmatprep.subr.bf16.mxu0 %v4102_v41  ;;  %v4186_v18 = vld [vmem:[%s5824_s1 + $0xa04] ss:$8 sps:$4 sm:$0xff]   ;;  %v498_v41 = vcombine.high %v5298_v22, %v5298_v22 }
  0xcb   :  { %2711 = vmatpush1.bf16.msra.mxu1 %v4097_v50  ;;  %v548_v50 = vcombine.high %v5301_v35, %v5301_v35 }
  0xcc   :  { %2957 = vmatpush1.bf16.msra.mxu0 %v4100_v51  ;;  %2712 = vmatprep.subr.bf16.mxu1 %v4105_v53  ;;  %v4181_v51 = vld [vmem:[%s5824_s1 + $0x400] ss:$8 sps:$4 sm:$0xff]   ;;  %v480_v53 = vcombine.high %v5104_v40, %v5104_v40  ;;  %v4187_v40 = vld [vmem:[%s5824_s1 + $0x410] ss:$8 sps:$4 sm:$0xff]  }
  0xcd   :  { %2958 = vmatprep.subr.bf16.mxu0 %v4108_v54  ;;  %v577_v54 = vcombine.high %v5108_v43, %v5108_v43  ;;  %v4190_v43 = vld [vmem:[%s5824_s1 + $0xa10] ss:$8 sps:$4 sm:$0xff]  }
  0xcf   :  { %2713 = vmatpush1.bf16.msra.mxu1 %v4103_v55  ;;  %v4184_v55 = vld [vmem:[%s5824_s1 + $0xa00] ss:$8 sps:$4 sm:$0xff]  }
  0xd0   :  { %2959 = vmatpush1.bf16.msra.mxu0 %v4106_v56  ;;  %2714 = vmatprep.subr.bf16.mxu1 %v4111_v57  ;;  %v4189_v56 = vld [vmem:[%s5824_s1 + $0x414] ss:$8 sps:$4 sm:$0xff]  }
  0xd1   :  { %2960 = vmatprep.subr.bf16.mxu0 %v4114_v58  ;;  %v4192_v57 = vld [vmem:[%s5824_s1 + $0xa14] ss:$8 sps:$4 sm:$0xff]   ;;  %v5342_v58 = vrot.slane %v498_v41, %v4596_v49 }
  0xd3   :  { %2715 = vmatpush1.bf16.msra.mxu1 %v4109_v59  ;;  %v5345_v59 = vrot.slane %v548_v50, %v4596_v49 }
  0xd4   :  { %2961 = vmatpush1.bf16.msra.mxu0 %v4112_v60  ;;  %2716 = vmatprep.subr.bf16.mxu1 %v4117_v61  ;;  %v4195_v60 = vld [vmem:[%s5824_s1 + $0x424] ss:$8 sps:$4 sm:$0xff]  }
  0xd5   :  { %2962 = vmatprep.subr.bf16.mxu0 %v4120_v62  ;;  %v4198_v61 = vld [vmem:[%s5824_s1 + $0xa24] ss:$8 sps:$4 sm:$0xff]   ;;  %v4193_v62 = vld [vmem:[%s5824_s1 + $0x420] ss:$8 sps:$4 sm:$0xff]  }
  0xd7   :  { %2717 = vmatpush1.bf16.msra.mxu1 %v4115_v63  ;;  %v4196_v63 = vld [vmem:[%s5824_s1 + $0xa20] ss:$8 sps:$4 sm:$0xff]  }
  0xd8   :  { %2963 = vmatpush1.bf16.msra.mxu0 %v4118_v0  ;;  %2718 = vmatprep.subr.bf16.mxu1 %v4123_v1  ;;  %v4201_v0 = vld [vmem:[%s5824_s1 + $0x434] ss:$8 sps:$4 sm:$0xff]  }
  0xd9   :  { %2964 = vmatprep.subr.bf16.mxu0 %v4126_v2  ;;  %v4204_v1 = vld [vmem:[%s5824_s1 + $0xa34] ss:$8 sps:$4 sm:$0xff]   ;;  %v4199_v2 = vld [vmem:[%s5824_s1 + $0x430] ss:$8 sps:$4 sm:$0xff]  }
  0xdb   :  { %2719 = vmatpush1.bf16.msra.mxu1 %v4121_v3  ;;  %v4202_v3 = vld [vmem:[%s5824_s1 + $0xa30] ss:$8 sps:$4 sm:$0xff]  }
  0xdc   :  { %2965 = vmatpush1.bf16.msra.mxu0 %v4124_v4  ;;  %2720 = vmatprep.subr.bf16.mxu1 %v4129_v5  ;;  %v4207_v4 = vld [vmem:[%s5824_s1 + $0x444] ss:$8 sps:$4 sm:$0xff]  }
  0xdd   :  { %2966 = vmatprep.subr.bf16.mxu0 %v4132_v6  ;;  %v4210_v5 = vld [vmem:[%s5824_s1 + $0xa44] ss:$8 sps:$4 sm:$0xff]   ;;  %v4205_v6 = vld [vmem:[%s5824_s1 + $0x440] ss:$8 sps:$4 sm:$0xff]  }
  0xdf   :  { %2721 = vmatpush1.bf16.msra.mxu1 %v4127_v7  ;;  %v4208_v7 = vld [vmem:[%s5824_s1 + $0xa40] ss:$8 sps:$4 sm:$0xff]  }
  0xe0   :  { %2967 = vmatpush1.bf16.msra.mxu0 %v4130_v8  ;;  %2722 = vmatprep.subr.bf16.mxu1 %v4135_v9  ;;  %v4213_v8 = vld [vmem:[%s5824_s1 + $0x454] ss:$8 sps:$4 sm:$0xff]  }
  0xe1   :  { %2968 = vmatprep.subr.bf16.mxu0 %v4138_v10  ;;  %v4216_v9 = vld [vmem:[%s5824_s1 + $0xa54] ss:$8 sps:$4 sm:$0xff]  }
  0xe3   :  { %2723 = vmatpush1.bf16.msra.mxu1 %v4133_v11 }
  0xe4   :  { %2969 = vmatpush1.bf16.msra.mxu0 %v4136_v12  ;;  %2724 = vmatprep.subr.bf16.mxu1 %v4141_v13 }
  0xe5   :  { %2970 = vmatprep.subr.bf16.mxu0 %v4144_v14 }
  0xe7   :  { %2725 = vmatpush1.bf16.msra.mxu1 %v4139_v15 }
  0xe8   :  { %2971 = vmatpush1.bf16.msra.mxu0 %v4142_v16  ;;  %2726 = vmatprep.subr.bf16.mxu1 %v4147_v19 }
  0xe9   :  { %2972 = vmatprep.subr.bf16.mxu0 %v4150_v20 }
  0xeb   :  { %2727 = vmatpush1.bf16.msra.mxu1 %v4145_v21 }
  0xec   :  { %2973 = vmatpush1.bf16.msra.mxu0 %v4148_v52  ;;  %2728 = vmatprep.subr.bf16.mxu1 %v4153_v23 }
  0xed   :  { %2974 = vmatprep.subr.bf16.mxu0 %v4156_v24 }
  0xef   :  { %2729 = vmatpush1.bf16.msra.mxu1 %v4151_v25 }
  0xf0   :  { %2975 = vmatpush1.bf16.msra.mxu0 %v4154_v26  ;;  %2730 = vmatprep.subr.bf16.mxu1 %v4159_v27 }
  0xf1   :  { %2976 = vmatprep.subr.bf16.mxu0 %v4162_v28 }
  0xf3   :  { %2731 = vmatpush1.bf16.msra.mxu1 %v4157_v29 }
  0xf4   :  { %2977 = vmatpush1.bf16.msra.mxu0 %v4160_v30  ;;  %2732 = vmatprep.subr.bf16.mxu1 %v4165_v31 }
  0xf5   :  { %2978 = vmatprep.subr.bf16.mxu0 %v4168_v32 }
  0xf7   :  { %2733 = vmatpush1.bf16.msra.mxu1 %v4163_v17 }
  0xf8   :  { %2979 = vmatpush1.bf16.msra.mxu0 %v4166_v34  ;;  %2734 = vmatprep.subr.bf16.mxu1 %v4171_v36 }
  0xf9   :  { %2980 = vmatprep.subr.bf16.mxu0 %v4174_v37 }
  0xfb   :  { %2735 = vmatpush1.bf16.msra.mxu1 %v4169_v39 }
  0xfc   :  { %2981 = vmatpush1.bf16.msra.mxu0 %v4172_v44  ;;  %2736 = vmatprep.subr.bf16.mxu1 %v4177_v45 }
  0xfd   :  { %2982 = vmatprep.subr.bf16.mxu0 %v4180_v33 }
  0xff   :  { %2737 = vmatpush1.bf16.msra.mxu1 %v4175_v46 }
 0x100   :  { %2983 = vmatpush1.bf16.msra.mxu0 %v4178_v47  ;;  %2747 = vmatprep.subr.bf16.mxu1 %v4183_v48 }
 0x101   :  { %2993 = vmatprep.subr.bf16.mxu0 %v4186_v18 }
 0x102   :  { %2739 = vmatmul.mubr.bf16.vlgmr.msra.gmra.mrb[0].mxu1 %v480_v53 }
 0x103   :  { %2985 = vmatmul.mubr.bf16.vlgmr.msra.gmra.mrb[0].mxu0 %v577_v54  ;;  %2748 = vmatpush1.bf16.msra.mxu1 %v4181_v51 }
 0x104   :  { %2994 = vmatpush1.bf16.msra.mxu0 %v4184_v55  ;;  %2749 = vmatprep.subr.bf16.mxu1 %v4189_v56 }
 0x105   :  { %2995 = vmatprep.subr.bf16.mxu0 %v4192_v57  ;;  %2779 = vmatprep.mubr.bf16.mxu1 %v5342_v58 }
 0x106   :  { %3025 = vmatprep.mubr.bf16.mxu0 %v5345_v59 }
 0x107   :  { %2750 = vmatpush1.bf16.msra.mxu1 %v4187_v40 }
 0x108   :  { %2996 = vmatpush1.bf16.msra.mxu0 %v4190_v43  ;;  %2751 = vmatprep.subr.bf16.mxu1 %v4195_v60 }
 0x109   :  { %2997 = vmatprep.subr.bf16.mxu0 %v4198_v61 }
 0x10b   :  { %2752 = vmatpush1.bf16.msra.mxu1 %v4193_v62 }
 0x10c   :  { %2998 = vmatpush1.bf16.msra.mxu0 %v4196_v63  ;;  %2753 = vmatprep.subr.bf16.mxu1 %v4201_v0 }
 0x10d   :  { %2999 = vmatprep.subr.bf16.mxu0 %v4204_v1 }
 0x10f   :  { %2754 = vmatpush1.bf16.msra.mxu1 %v4199_v2 }
 0x110   :  { %3000 = vmatpush1.bf16.msra.mxu0 %v4202_v3  ;;  %2755 = vmatprep.subr.bf16.mxu1 %v4207_v4 }
 0x111   :  { %3001 = vmatprep.subr.bf16.mxu0 %v4210_v5 }
 0x112   :  { %10 = vsyncpa [#allocation3], 0  ;;  %v4211_v10 = vld [vmem:[%s5824_s1 + $0x450] ss:$8 sps:$4 sm:$0xff]   ;;  %v4219_v12 = vld [vmem:[%s5824_s1 + $0x464] ss:$8 sps:$4 sm:$0xff]   ;;  %v5525_v60 = vrot.slane %v5298_v22, %v4596_v49  ;;  %v5529_v61 = vrot.slane %v5301_v35, %v4596_v49  ;;  %v530_v0 = vcombine.high %v5342_v58, %v5342_v58  ;;  %v580_v1 = vcombine.high %v5345_v59, %v5345_v59 }
 0x113   :  { %2756 = vmatpush1.bf16.msra.mxu1 %v4205_v6  ;;  %v4214_v11 = vld [vmem:[%s5824_s1 + $0xa50] ss:$8 sps:$4 sm:$0xff]   ;;  %v4222_v13 = vld [vmem:[%s5824_s1 + $0xa64] ss:$8 sps:$4 sm:$0xff]   ;;  %v4217_v14 = vld [vmem:[%s5824_s1 + $0x460] ss:$8 sps:$4 sm:$0xff]  }
 0x114   :  { %3002 = vmatpush1.bf16.msra.mxu0 %v4208_v7  ;;  %2757 = vmatprep.subr.bf16.mxu1 %v4213_v8  ;;  %v4220_v15 = vld [vmem:[%s5824_s1 + $0xa60] ss:$8 sps:$4 sm:$0xff]   ;;  %v4225_v16 = vld [vmem:[%s5824_s1 + $0x474] ss:$8 sps:$4 sm:$0xff]   ;;  %v4223_v20 = vld [vmem:[%s5824_s1 + $0x470] ss:$8 sps:$4 sm:$0xff]  }
 0x115   :  { %3003 = vmatprep.subr.bf16.mxu0 %v4216_v9  ;;  %v4228_v19 = vld [vmem:[%s5824_s1 + $0xa74] ss:$8 sps:$4 sm:$0xff]   ;;  %v4226_v21 = vld [vmem:[%s5824_s1 + $0xa70] ss:$8 sps:$4 sm:$0xff]   ;;  %v4231_v52 = vld [vmem:[%s5824_s1 + $0x484] ss:$8 sps:$4 sm:$0xff]  }
 0x116   :  { %v4234_v23 = vld [vmem:[%s5824_s1 + $0xa84] ss:$8 sps:$4 sm:$0xff]   ;;  %v4229_v24 = vld [vmem:[%s5824_s1 + $0x480] ss:$8 sps:$4 sm:$0xff]   ;;  %v4237_v26 = vld [vmem:[%s5824_s1 + $0x494] ss:$8 sps:$4 sm:$0xff]  }
 0x117   :  { %2758 = vmatpush1.bf16.msra.mxu1 %v4211_v10  ;;  %v4232_v25 = vld [vmem:[%s5824_s1 + $0xa80] ss:$8 sps:$4 sm:$0xff]   ;;  %v4240_v27 = vld [vmem:[%s5824_s1 + $0xa94] ss:$8 sps:$4 sm:$0xff]   ;;  %v4235_v28 = vld [vmem:[%s5824_s1 + $0x490] ss:$8 sps:$4 sm:$0xff]  }
 0x118   :  { %3004 = vmatpush1.bf16.msra.mxu0 %v4214_v11  ;;  %2759 = vmatprep.subr.bf16.mxu1 %v4219_v12  ;;  %v4238_v29 = vld [vmem:[%s5824_s1 + $0xa90] ss:$8 sps:$4 sm:$0xff]   ;;  %v4243_v30 = vld [vmem:[%s5824_s1 + $0x4a4] ss:$8 sps:$4 sm:$0xff]   ;;  %v4241_v32 = vld [vmem:[%s5824_s1 + $0x4a0] ss:$8 sps:$4 sm:$0xff]  }
 0x119   :  { %3005 = vmatprep.subr.bf16.mxu0 %v4222_v13  ;;  %v4246_v31 = vld [vmem:[%s5824_s1 + $0xaa4] ss:$8 sps:$4 sm:$0xff]   ;;  %v4244_v17 = vld [vmem:[%s5824_s1 + $0xaa0] ss:$8 sps:$4 sm:$0xff]   ;;  %v4249_v34 = vld [vmem:[%s5824_s1 + $0x4b4] ss:$8 sps:$4 sm:$0xff]  }
 0x11a   :  { %v4252_v36 = vld [vmem:[%s5824_s1 + $0xab4] ss:$8 sps:$4 sm:$0xff]   ;;  %v4247_v37 = vld [vmem:[%s5824_s1 + $0x4b0] ss:$8 sps:$4 sm:$0xff]   ;;  %v4255_v39 = vld [vmem:[%s5824_s1 + $0x4c4] ss:$8 sps:$4 sm:$0xff]  }
 0x11b   :  { %2760 = vmatpush1.bf16.msra.mxu1 %v4217_v14  ;;  %v4250_v38 = vld [vmem:[%s5824_s1 + $0xab0] ss:$8 sps:$4 sm:$0xff]   ;;  %v4258_v44 = vld [vmem:[%s5824_s1 + $0xac4] ss:$8 sps:$4 sm:$0xff]   ;;  %v4253_v45 = vld [vmem:[%s5824_s1 + $0x4c0] ss:$8 sps:$4 sm:$0xff]  }
 0x11c   :  { %3006 = vmatpush1.bf16.msra.mxu0 %v4220_v15  ;;  %2761 = vmatprep.subr.bf16.mxu1 %v4225_v16  ;;  %v4256_v33 = vld [vmem:[%s5824_s1 + $0xac0] ss:$8 sps:$4 sm:$0xff]   ;;  %v4261_v46 = vld [vmem:[%s5824_s1 + $0x4d4] ss:$8 sps:$4 sm:$0xff]   ;;  %v4259_v48 = vld [vmem:[%s5824_s1 + $0x4d0] ss:$8 sps:$4 sm:$0xff]  }
 0x11d   :  { %3007 = vmatprep.subr.bf16.mxu0 %v4228_v19  ;;  %v4264_v47 = vld [vmem:[%s5824_s1 + $0xad4] ss:$8 sps:$4 sm:$0xff]   ;;  %v4262_v18 = vld [vmem:[%s5824_s1 + $0xad0] ss:$8 sps:$4 sm:$0xff]   ;;  %v4267_v41 = vld [vmem:[%s5824_s1 + $0x4e4] ss:$8 sps:$4 sm:$0xff]  }
 0x11e   :  { %v4270_v50 = vld [vmem:[%s5824_s1 + $0xae4] ss:$8 sps:$4 sm:$0xff]   ;;  %v4265_v51 = vld [vmem:[%s5824_s1 + $0x4e0] ss:$8 sps:$4 sm:$0xff]   ;;  %v4273_v54 = vld [vmem:[%s5824_s1 + $0x4f4] ss:$8 sps:$4 sm:$0xff]  }
 0x11f   :  { %2762 = vmatpush1.bf16.msra.mxu1 %v4223_v20  ;;  %v4268_v53 = vld [vmem:[%s5824_s1 + $0xae0] ss:$8 sps:$4 sm:$0xff]   ;;  %v4276_v55 = vld [vmem:[%s5824_s1 + $0xaf4] ss:$8 sps:$4 sm:$0xff]   ;;  %v4271_v56 = vld [vmem:[%s5824_s1 + $0x4f0] ss:$8 sps:$4 sm:$0xff]  }
 0x120   :  { %3008 = vmatpush1.bf16.msra.mxu0 %v4226_v21  ;;  %2763 = vmatprep.subr.bf16.mxu1 %v4231_v52  ;;  %v4274_v57 = vld [vmem:[%s5824_s1 + $0xaf0] ss:$8 sps:$4 sm:$0xff]   ;;  %v4279_v40 = vld [vmem:[%s5824_s1 + $0x504] ss:$8 sps:$4 sm:$0xff]   ;;  %v4277_v62 = vld [vmem:[%s5824_s1 + $0x500] ss:$8 sps:$4 sm:$0xff]  }
 0x121   :  { %3009 = vmatprep.subr.bf16.mxu0 %v4234_v23  ;;  %v4283_v43 = vld [vmem:[%s5824_s1 + $0xb04] ss:$8 sps:$4 sm:$0xff]   ;;  %v4281_v63 = vld [vmem:[%s5824_s1 + $0xb00] ss:$8 sps:$4 sm:$0xff]   ;;  %v4286_v22 = vld [vmem:[%s5824_s1 + $0x514] ss:$8 sps:$4 sm:$0xff]  }
 0x122   :  { %v4289_v35 = vld [vmem:[%s5824_s1 + $0xb14] ss:$8 sps:$4 sm:$0xff]   ;;  %v4284_v2 = vld [vmem:[%s5824_s1 + $0x510] ss:$8 sps:$4 sm:$0xff]   ;;  %v4292_v58 = vld [vmem:[%s5824_s1 + $0x524] ss:$8 sps:$4 sm:$0xff]  }
 0x123   :  { %2764 = vmatpush1.bf16.msra.mxu1 %v4229_v24  ;;  %v4287_v3 = vld [vmem:[%s5824_s1 + $0xb10] ss:$8 sps:$4 sm:$0xff]   ;;  %v4295_v59 = vld [vmem:[%s5824_s1 + $0xb24] ss:$8 sps:$4 sm:$0xff]   ;;  %v4290_v4 = vld [vmem:[%s5824_s1 + $0x520] ss:$8 sps:$4 sm:$0xff]  }
 0x124   :  { %3010 = vmatpush1.bf16.msra.mxu0 %v4232_v25  ;;  %2765 = vmatprep.subr.bf16.mxu1 %v4237_v26  ;;  %v4293_v5 = vld [vmem:[%s5824_s1 + $0xb20] ss:$8 sps:$4 sm:$0xff]   ;;  %v4298_v6 = vld [vmem:[%s5824_s1 + $0x534] ss:$8 sps:$4 sm:$0xff]   ;;  %v4296_v8 = vld [vmem:[%s5824_s1 + $0x530] ss:$8 sps:$4 sm:$0xff]  }
 0x125   :  { %3011 = vmatprep.subr.bf16.mxu0 %v4240_v27  ;;  %v4301_v7 = vld [vmem:[%s5824_s1 + $0xb34] ss:$8 sps:$4 sm:$0xff]   ;;  %v4299_v9 = vld [vmem:[%s5824_s1 + $0xb30] ss:$8 sps:$4 sm:$0xff]   ;;  %v4304_v10 = vld [vmem:[%s5824_s1 + $0x544] ss:$8 sps:$4 sm:$0xff]  }
 0x126   :  { %v4307_v11 = vld [vmem:[%s5824_s1 + $0xb44] ss:$8 sps:$4 sm:$0xff]   ;;  %v4302_v12 = vld [vmem:[%s5824_s1 + $0x540] ss:$8 sps:$4 sm:$0xff]   ;;  %v4310_v14 = vld [vmem:[%s5824_s1 + $0x554] ss:$8 sps:$4 sm:$0xff]  }
 0x127   :  { %2766 = vmatpush1.bf16.msra.mxu1 %v4235_v28  ;;  %v4305_v13 = vld [vmem:[%s5824_s1 + $0xb40] ss:$8 sps:$4 sm:$0xff]   ;;  %v4313_v15 = vld [vmem:[%s5824_s1 + $0xb54] ss:$8 sps:$4 sm:$0xff]   ;;  %v4308_v16 = vld [vmem:[%s5824_s1 + $0x550] ss:$8 sps:$4 sm:$0xff]  }
 0x128   :  { %3012 = vmatpush1.bf16.msra.mxu0 %v4238_v29  ;;  %2767 = vmatprep.subr.bf16.mxu1 %v4243_v30  ;;  %v4311_v19 = vld [vmem:[%s5824_s1 + $0xb50] ss:$8 sps:$4 sm:$0xff]   ;;  %v4316_v20 = vld [vmem:[%s5824_s1 + $0x564] ss:$8 sps:$4 sm:$0xff]   ;;  %v4314_v52 = vld [vmem:[%s5824_s1 + $0x560] ss:$8 sps:$4 sm:$0xff]  }
 0x129   :  { %3013 = vmatprep.subr.bf16.mxu0 %v4246_v31  ;;  %v4319_v21 = vld [vmem:[%s5824_s1 + $0xb64] ss:$8 sps:$4 sm:$0xff]   ;;  %v4317_v23 = vld [vmem:[%s5824_s1 + $0xb60] ss:$8 sps:$4 sm:$0xff]   ;;  %v4322_v24 = vld [vmem:[%s5824_s1 + $0x574] ss:$8 sps:$4 sm:$0xff]  }
 0x12a   :  { %v4325_v25 = vld [vmem:[%s5824_s1 + $0xb74] ss:$8 sps:$4 sm:$0xff]   ;;  %v4320_v26 = vld [vmem:[%s5824_s1 + $0x570] ss:$8 sps:$4 sm:$0xff]   ;;  %v4328_v28 = vld [vmem:[%s5824_s1 + $0x584] ss:$8 sps:$4 sm:$0xff]  }
 0x12b   :  { %2768 = vmatpush1.bf16.msra.mxu1 %v4241_v32  ;;  %v4323_v27 = vld [vmem:[%s5824_s1 + $0xb70] ss:$8 sps:$4 sm:$0xff]   ;;  %v4331_v29 = vld [vmem:[%s5824_s1 + $0xb84] ss:$8 sps:$4 sm:$0xff]   ;;  %v4326_v30 = vld [vmem:[%s5824_s1 + $0x580] ss:$8 sps:$4 sm:$0xff]  }
 0x12c   :  { %3014 = vmatpush1.bf16.msra.mxu0 %v4244_v17  ;;  %2769 = vmatprep.subr.bf16.mxu1 %v4249_v34  ;;  %v4329_v31 = vld [vmem:[%s5824_s1 + $0xb80] ss:$8 sps:$4 sm:$0xff]   ;;  %v4334_v32 = vld [vmem:[%s5824_s1 + $0x594] ss:$8 sps:$4 sm:$0xff]   ;;  %v4332_v34 = vld [vmem:[%s5824_s1 + $0x590] ss:$8 sps:$4 sm:$0xff]  }
 0x12d   :  { %3015 = vmatprep.subr.bf16.mxu0 %v4252_v36  ;;  %v4337_v17 = vld [vmem:[%s5824_s1 + $0xb94] ss:$8 sps:$4 sm:$0xff]   ;;  %v4335_v36 = vld [vmem:[%s5824_s1 + $0xb90] ss:$8 sps:$4 sm:$0xff]   ;;  %vm2579_vm0 = vcmask 523264   ;;  %s4430_s19 = smov [#allocation2]  }
 0x12e   :  { %s3303_s20 = sshll.u32 %s4430_s19, 4  ;;  %vm3295_vm1 = vcmask 254976   ;;  %s3304_s20 = int_to_ptr.vmem [resolvable:$true] %s3303_s20 }
 0x12f   :  { %2770 = vmatpush1.bf16.msra.mxu1 %v4247_v37  ;;  %v4340_v37 = vld [vmem:[%s5824_s1 + $0x5a4] ss:$8 sps:$4 sm:$0xff]   ;;  %s4404_s21 = scalar_lea.vmem %s3304_s20, 32  ;;  %p4409_p1 = scmp.lt.s32.totalorder %s3304_s20, %s3304_s20 }
 0x130   :  { %3016 = vmatpush1.bf16.msra.mxu0 %v4250_v38  ;;  %2771 = vmatprep.subr.bf16.mxu1 %v4255_v39  ;;  %v4343_v38 = vld [vmem:[%s5824_s1 + $0xba4] ss:$8 sps:$4 sm:$0xff]   ;;  %v4338_v39 = vld [vmem:[%s5824_s1 + $0x5a0] ss:$8 sps:$4 sm:$0xff]   ;;  %p4405_p0 = scmp.ne.s32.totalorder %s3304_s20, %s4404_s21  ;;  %p4410_p2 = scmp.lt.s32.totalorder %s4404_s21, %s4404_s21 }
 0x131   :  { %3017 = vmatprep.subr.bf16.mxu0 %v4258_v44  ;;  %v4341_v44 = vld [vmem:[%s5824_s1 + $0xba0] ss:$8 sps:$4 sm:$0xff]  }
 0x132   :  { %p4411_p3 = por %p4410_p2, %p4409_p1 }
 0x133   :  { %2772 = vmatpush1.bf16.msra.mxu1 %v4253_v45  ;;  %v4346_v45 = vld [vmem:[%s5824_s1 + $0x5b4] ss:$8 sps:$4 sm:$0xff]  }
 0x134   :  { %3018 = vmatpush1.bf16.msra.mxu0 %v4256_v33  ;;  %2773 = vmatprep.subr.bf16.mxu1 %v4261_v46  ;;  %v4349_v33 = vld [vmem:[%s5824_s1 + $0xbb4] ss:$8 sps:$4 sm:$0xff]   ;;  %v4344_v46 = vld [vmem:[%s5824_s1 + $0x5b0] ss:$8 sps:$4 sm:$0xff]   ;;  %p4412_p4 = pnand %p4411_p3, %p4405_p0 }
 0x135   :  { %3019 = vmatprep.subr.bf16.mxu0 %v4264_v47  ;;  %v4347_v47 = vld [vmem:[%s5824_s1 + $0xbb0] ss:$8 sps:$4 sm:$0xff]  }
 0x137   :  { %2774 = vmatpush1.bf16.msra.mxu1 %v4259_v48  ;;  %v4352_v48 = vld [vmem:[%s5824_s1 + $0x5c4] ss:$8 sps:$4 sm:$0xff]  }
 0x138   :  { %3020 = vmatpush1.bf16.msra.mxu0 %v4262_v18  ;;  %2775 = vmatprep.subr.bf16.mxu1 %v4267_v41  ;;  %v4355_v18 = vld [vmem:[%s5824_s1 + $0xbc4] ss:$8 sps:$4 sm:$0xff]   ;;  %v4350_v41 = vld [vmem:[%s5824_s1 + $0x5c0] ss:$8 sps:$4 sm:$0xff]  }
 0x139   :  { %3021 = vmatprep.subr.bf16.mxu0 %v4270_v50  ;;  %v4353_v50 = vld [vmem:[%s5824_s1 + $0xbc0] ss:$8 sps:$4 sm:$0xff]  }
 0x13b   :  { %2776 = vmatpush1.bf16.msra.mxu1 %v4265_v51  ;;  %v4358_v51 = vld [vmem:[%s5824_s1 + $0x5d4] ss:$8 sps:$4 sm:$0xff]  }
 0x13c   :  { %3022 = vmatpush1.bf16.msra.mxu0 %v4268_v53  ;;  %2777 = vmatprep.subr.bf16.mxu1 %v4273_v54  ;;  %v4361_v53 = vld [vmem:[%s5824_s1 + $0xbd4] ss:$8 sps:$4 sm:$0xff]   ;;  %v4356_v54 = vld [vmem:[%s5824_s1 + $0x5d0] ss:$8 sps:$4 sm:$0xff]  }
 0x13d   :  { %3023 = vmatprep.subr.bf16.mxu0 %v4276_v55  ;;  %v4359_v55 = vld [vmem:[%s5824_s1 + $0xbd0] ss:$8 sps:$4 sm:$0xff]  }
 0x13f   :  { %2778 = vmatpush1.bf16.msra.mxu1 %v4271_v56  ;;  %v4364_v56 = vld [vmem:[%s5824_s1 + $0x5e4] ss:$8 sps:$4 sm:$0xff]  }
 0x140   :  { %3024 = vmatpush1.bf16.msra.mxu0 %v4274_v57  ;;  %2788 = vmatprep.subr.bf16.mxu1 %v4279_v40  ;;  %v4367_v57 = vld [vmem:[%s5824_s1 + $0xbe4] ss:$8 sps:$4 sm:$0xff]   ;;  %v4362_v40 = vld [vmem:[%s5824_s1 + $0x5e0] ss:$8 sps:$4 sm:$0xff]  }
 0x141   :  { %3034 = vmatprep.subr.bf16.mxu0 %v4283_v43  ;;  %v4365_v43 = vld [vmem:[%s5824_s1 + $0xbe0] ss:$8 sps:$4 sm:$0xff]  }
 0x142   :  { %2780 = vmatmul.mubr.bf16.vlgmr.msra.gmra.mrb[0].mxu1 %v5525_v60 }
 0x143   :  { %3026 = vmatmul.mubr.bf16.vlgmr.msra.gmra.mrb[0].mxu0 %v5529_v61  ;;  %2789 = vmatpush1.bf16.msra.mxu1 %v4277_v62  ;;  %v4370_v62 = vld [vmem:[%s5824_s1 + $0x5f4] ss:$8 sps:$4 sm:$0xff]  }
 0x144   :  { %3035 = vmatpush1.bf16.msra.mxu0 %v4281_v63  ;;  %2790 = vmatprep.subr.bf16.mxu1 %v4286_v22  ;;  %v4373_v63 = vld [vmem:[%s5824_s1 + $0xbf4] ss:$8 sps:$4 sm:$0xff]   ;;  %v4368_v22 = vld [vmem:[%s5824_s1 + $0x5f0] ss:$8 sps:$4 sm:$0xff]  }
 0x145   :  { %3036 = vmatprep.subr.bf16.mxu0 %v4289_v35  ;;  %2820 = vmatprep.mubr.bf16.mxu1 %v530_v0  ;;  %v4371_v35 = vld [vmem:[%s5824_s1 + $0xbf0] ss:$8 sps:$4 sm:$0xff]   ;;  %v4376_v0 = vld [vmem:[%s5824_s1 + $0xc04] ss:$8 sps:$4 sm:$0xff]  }
 0x146   :  { %3066 = vmatprep.mubr.bf16.mxu0 %v580_v1  ;;  %v4386_v1 = vld [vmem:[%s5826_s3 + $0x40] sm:$0xff]  }
 0x147   :  { %2791 = vmatpush1.bf16.msra.mxu1 %v4284_v2  ;;  %v528_v2 = vcombine.high %v5525_v60, %v5525_v60  ;;  %v4388_v60 = vld [vmem:[%s5826_s3 + $0x48] sm:$0xff]  }
 0x148   :  { %3037 = vmatpush1.bf16.msra.mxu0 %v4287_v3  ;;  %2792 = vmatprep.subr.bf16.mxu1 %v4292_v58  ;;  %v578_v3 = vcombine.high %v5529_v61, %v5529_v61  ;;  %v4374_v58 = vld [vmem:[%s5824_s1 + $0xc00] ss:$8 sps:$4 sm:$0xff]   ;;  %v4377_v61 = vld [vmem:[%s5824_s1 + $0xc10] ss:$8 sps:$4 sm:$0xff]  }
 0x149   :  { %3038 = vmatprep.subr.bf16.mxu0 %v4295_v59  ;;  %v4379_v59 = vld [vmem:[%s5824_s1 + $0xc14] ss:$8 sps:$4 sm:$0xff]  }
 0x14b   :  { %2793 = vmatpush1.bf16.msra.mxu1 %v4290_v4  ;;  %v4387_v4 = vld [vmem:[%s5826_s3] sm:$0xff]  }
 0x14c   :  { %3039 = vmatpush1.bf16.msra.mxu0 %v4293_v5  ;;  %2794 = vmatprep.subr.bf16.mxu1 %v4298_v6  ;;  %v4429_v5 = vmov 0   ;;  %v4382_v6 = vld [vmem:[%s5824_s1 + $0xc24] ss:$8 sps:$4 sm:$0xff]  }
 0x14d   :  { %3040 = vmatprep.subr.bf16.mxu0 %v4301_v7  ;;  %v4389_v7 = vld [vmem:[%s5826_s3 + $0x8] sm:$0xff]  }
 0x14f   :  { %2795 = vmatpush1.bf16.msra.mxu1 %v4296_v8  ;;  %v4380_v8 = vld [vmem:[%s5824_s1 + $0xc20] ss:$8 sps:$4 sm:$0xff]  }
 0x150   :  { %3041 = vmatpush1.bf16.msra.mxu0 %v4299_v9  ;;  %2796 = vmatprep.subr.bf16.mxu1 %v4304_v10  ;;  %v4385_v9 = vld [vmem:[%s5824_s1 + $0xc34] ss:$8 sps:$4 sm:$0xff]   ;;  %v4383_v10 = vld [vmem:[%s5824_s1 + $0xc30] ss:$8 sps:$4 sm:$0xff]  }
 0x151   :  { %3042 = vmatprep.subr.bf16.mxu0 %v4307_v11  ;;  %v3311_v11 = vld.sshfl [vmem:[%s5823_s0 + $0x18] sm:$0x1 pattern:$0x75316420] }
 0x153   :  { %2797 = vmatpush1.bf16.msra.mxu1 %v4302_v12  ;;  %v594_v12 = vrot.slane %v3311_v11, %v4596_v49  ;;  %v4393_v49 = vld [vmem:[%s5826_s3 + $0x18] sm:$0xff]  }
 0x154   :  { %3043 = vmatpush1.bf16.msra.mxu0 %v4305_v13  ;;  %2798 = vmatprep.subr.bf16.mxu1 %v4310_v14  ;;  %v4390_v13 = vld [vmem:[%s5826_s3 + $0x50] sm:$0xff]  }
 0x155   :  { %3044 = vmatprep.subr.bf16.mxu0 %v4313_v15  ;;  %v4391_v14 = vld [vmem:[%s5826_s3 + $0x10] sm:$0xff]   ;;  %v4392_v15 = vld [vmem:[%s5826_s3 + $0x58] sm:$0xff]  }
 0x157   :  { %2799 = vmatpush1.bf16.msra.mxu1 %v4308_v16  ;;  %v4394_v16 = vld [vmem:[%s5826_s3 + $0x60] sm:$0xff]  }
 0x158   :  { %3045 = vmatpush1.bf16.msra.mxu0 %v4311_v19  ;;  %2800 = vmatprep.subr.bf16.mxu1 %v4316_v20  ;;  %v4395_v19 = vld [vmem:[%s5826_s3 + $0x20] sm:$0xff]   ;;  %v4396_v20 = vld [vmem:[%s5826_s3 + $0x68] sm:$0xff]  }
 0x159   :  { %3046 = vmatprep.subr.bf16.mxu0 %v4319_v21  ;;  %v4397_v21 = vld [vmem:[%s5826_s3 + $0x28] sm:$0xff]  }
 0x15b   :  { %2801 = vmatpush1.bf16.msra.mxu1 %v4314_v52  ;;  %v4398_v52 = vld [vmem:[%s5826_s3 + $0x70] sm:$0xff]  }
 0x15c   :  { %3047 = vmatpush1.bf16.msra.mxu0 %v4317_v23  ;;  %2802 = vmatprep.subr.bf16.mxu1 %v4322_v24  ;;  %v4399_v23 = vld [vmem:[%s5826_s3 + $0x30] sm:$0xff]   ;;  %v4400_v24 = vld [vmem:[%s5826_s3 + $0x78] sm:$0xff]  }
 0x15d   :  { %3048 = vmatprep.subr.bf16.mxu0 %v4325_v25  ;;  %v4401_v25 = vld [vmem:[%s5826_s3 + $0x38] sm:$0xff]  }
 0x15f   :  { %2803 = vmatpush1.bf16.msra.mxu1 %v4320_v26 }
 0x160   :  { %3049 = vmatpush1.bf16.msra.mxu0 %v4323_v27  ;;  %2804 = vmatprep.subr.bf16.mxu1 %v4328_v28 }
 0x161   :  { %3050 = vmatprep.subr.bf16.mxu0 %v4331_v29 }
 0x163   :  { %2805 = vmatpush1.bf16.msra.mxu1 %v4326_v30  ;;  %v422_v30 = vsub.s32 0, %v4578_v42 }
 0x164   :  { %3051 = vmatpush1.bf16.msra.mxu0 %v4329_v31  ;;  %2806 = vmatprep.subr.bf16.mxu1 %v4334_v32  ;;  %v418_v31 = vld [vmem:[%s5825_s2] sm:$0x3]  ;;  %v426_v32 = vsub.s32 1, %v4578_v42 }
 0x165   :  { %3052 = vmatprep.subr.bf16.mxu0 %v4337_v17  ;;  %v423_v17 = vrot.slane %v418_v31, %v422_v30  ;;  %v3705_v42 = vld [vmem:[%s5827_s4] ss:$0 sm:$0xff] }
 0x167   :  { %2807 = vmatpush1.bf16.msra.mxu1 %v4332_v34  ;;  %v427_v34 = vrot.slane %v418_v31, %v426_v32 }
 0x168   :  { %3053 = vmatpush1.bf16.msra.mxu0 %v4335_v36  ;;  %2808 = vmatprep.subr.bf16.mxu1 %v4340_v37 }
 0x169   :  { %3054 = vmatprep.subr.bf16.mxu0 %v4343_v38 }
 0x16b   :  { %2809 = vmatpush1.bf16.msra.mxu1 %v4338_v39 }
 0x16c   :  { %3055 = vmatpush1.bf16.msra.mxu0 %v4341_v44  ;;  %2810 = vmatprep.subr.bf16.mxu1 %v4346_v45 }
 0x16d   :  { %3056 = vmatprep.subr.bf16.mxu0 %v4349_v33 }
 0x16f   :  { %2811 = vmatpush1.bf16.msra.mxu1 %v4344_v46 }
 0x170   :  { %3057 = vmatpush1.bf16.msra.mxu0 %v4347_v47  ;;  %2812 = vmatprep.subr.bf16.mxu1 %v4352_v48 }
 0x171   :  { %3058 = vmatprep.subr.bf16.mxu0 %v4355_v18 }
 0x173   :  { %2813 = vmatpush1.bf16.msra.mxu1 %v4350_v41 }
 0x174   :  { %3059 = vmatpush1.bf16.msra.mxu0 %v4353_v50  ;;  %2814 = vmatprep.subr.bf16.mxu1 %v4358_v51 }
 0x175   :  { %3060 = vmatprep.subr.bf16.mxu0 %v4361_v53 }
 0x177   :  { %2815 = vmatpush1.bf16.msra.mxu1 %v4356_v54 }
 0x178   :  { %3061 = vmatpush1.bf16.msra.mxu0 %v4359_v55  ;;  %2816 = vmatprep.subr.bf16.mxu1 %v4364_v56 }
 0x179   :  { %3062 = vmatprep.subr.bf16.mxu0 %v4367_v57 }
 0x17b   :  { %2817 = vmatpush1.bf16.msra.mxu1 %v4362_v40 }
 0x17c   :  { %3063 = vmatpush1.bf16.msra.mxu0 %v4365_v43  ;;  %2818 = vmatprep.subr.bf16.mxu1 %v4370_v62 }
 0x17d   :  { %3064 = vmatprep.subr.bf16.mxu0 %v4373_v63 }
 0x17f   :  { %2819 = vmatpush1.bf16.msra.mxu1 %v4368_v22 }
 0x180   :  { %3065 = vmatpush1.bf16.msra.mxu0 %v4371_v35  ;;  %3722 = vmatprep.subr.bf16.mxu1 %v4386_v1 }
 0x181   :  { %3075 = vmatprep.subr.bf16.mxu0 %v4376_v0 }
 0x182   :  { %2821 = vmatmul.mubr.bf16.vlgmr.msra.gmra.mrb[0].mxu1 %v528_v2 }
 0x183   :  { %3067 = vmatmul.mubr.bf16.vlgmr.msra.gmra.mrb[0].mxu0 %v578_v3  ;;  %3723 = vmatpush3.bf16.msra.mxu1 %v4387_v4 }
 0x184   :  { %3076 = vmatpush1.bf16.msra.mxu0 %v4374_v58  ;;  %3107 = vmatprep.mubr.bf16.mxu0 %v4429_v5 }
 0x185   :  { %3077 = vmatprep.subr.bf16.mxu0 %v4379_v59  ;;  %3724 = vmatprep.subr.bf16.mxu1 %v4388_v60 }
 0x187   :  { %3725 = vmatpush3.bf16.msra.mxu1 %v4389_v7 }
 0x188   :  { %3078 = vmatpush1.bf16.msra.mxu0 %v4377_v61  ;;  %3726 = vmatprep.subr.bf16.mxu1 %v4390_v13 }
 0x189   :  { %3079 = vmatprep.subr.bf16.mxu0 %v4382_v6 }
 0x18b   :  { %3727 = vmatpush3.bf16.msra.mxu1 %v4391_v14 }
 0x18c   :  { %3080 = vmatpush1.bf16.msra.mxu0 %v4380_v8  ;;  %3728 = vmatprep.subr.bf16.mxu1 %v4392_v15 }
 0x18d   :  { %3081 = vmatprep.subr.bf16.mxu0 %v4385_v9 }
 0x18f   :  { %3729 = vmatpush3.bf16.msra.mxu1 %v4393_v49 }
 0x190   :  { %3082 = vmatpush1.bf16.msra.mxu0 %v4383_v10  ;;  %3730 = vmatprep.subr.bf16.mxu1 %v4394_v16 }
 0x193   :  { %3704 = vmatmul.mubr.msk.bf16.vlgmr.msra.gmra.mrb[0].mxu0 %vm2579_vm0, %v594_v12  ;;  %3731 = vmatpush3.bf16.msra.mxu1 %v4395_v19 }
 0x194   :  { %3732 = vmatprep.subr.bf16.mxu1 %v4396_v20 }
 0x197   :  { %3733 = vmatpush3.bf16.msra.mxu1 %v4397_v21 }
 0x198   :  { %3734 = vmatprep.subr.bf16.mxu1 %v4398_v52 }
 0x19b   :  { %3735 = vmatpush3.bf16.msra.mxu1 %v4399_v23 }
 0x19c   :  { %3736 = vmatprep.subr.bf16.mxu1 %v4400_v24 }
 0x19f   :  { %3737 = vmatpush3.bf16.msra.mxu1 %v4401_v25 }
 0x255   :  { %v2822_v26 = vpop.f32.mrb[0].mxu1 }
 0x256   :  { %v2824_v27 = vpop.f32.mrb[1].mxu1  ;;  %v3744_v36 = vadd.f32 %v2822_v26, %v423_v17 }
 0x257   :  { %v2826_v28 = vpop.f32.mrb[2].mxu1  ;;  %v3746_v37 = vadd.f32 %v2824_v27, %v427_v34 }
 0x258   :  { %v2827_v29 = vpop.f32.mrb[3].mxu1 }
 0x266   :  { %v3109_v38 = vpop.f32.mrb[0].mxu0 }
 0x267   :  { %v3745_v39 = vadd.f32 %v3744_v36, %v3109_v38  ;;  %v3111_v44 = vpop.f32.mrb[1].mxu0 }
 0x268   :  { %v3747_v45 = vadd.f32 %v3746_v37, %v3111_v44  ;;  %v3113_v33 = vpop.f32.mrb[2].mxu0 }
 0x269   :  { %v3116_v46 = vmax.f32 %v3745_v39, 0.0  ;;  %v3114_v47 = vpop.f32.mrb[3].mxu0 }
 0x26a   :  { %v3117_v48 = vmax.f32 %v3747_v45, 0.0 }
 0x26b   :  { %v3118_v41 = vpack.c.bf16 %v3116_v46, %v3116_v46 }
 0x26c   :  { %v3119_v18 = vpack.c.bf16 %v3117_v48, %v3117_v48 }
 0x26e   :  { %3287 = vmatprep.mubr.bf16.mxu1 %v3119_v18 }
 0x26f   :  { %3288 = vmatmul.mubr.bf16.vlgmr.msra.gmra.mrb[4].mxu1 %v3118_v41 }
 0x342   :  { %v3738_v50 = vpop.f32.mrb[4].mxu1 }
 0x343   :  { %v3739_v51 = vpop.f32.mrb[5].mxu1 }
 0x344   :  { %v3740_v53 = vadd.f32 %v3739_v51, %v3738_v50  ;;  %v3741_v54 = vpop.f32.mrb[6].mxu1 }
 0x345   :  { %v3742_v55 = vpop.f32.mrb[7].mxu1 }
 0x346   :  { %v3290_v56 = vadd.f32 %v3740_v53, %v3705_v42 }
 0x348   :  { %3296 = vst.msk [vmem:[#allocation2] sm:$0x3] %vm3295_vm1, %v3290_v56 }
 0x349   :  { %4415 = shalt.err (!%p4412_p4)
}
 0x34a   :  { %s4416_s4 = scalar_lea.hbm %s5828_s5, 32 }
 0x34b   :  { %p4417_p5 = scmp.ne.s32.totalorder %s5828_s5, %s4416_s4  ;;  %p4420_p6 = scmp.lt.u32.totalorder %s4416_s4, %s5828_s5 }
 0x34d   :  { %p4422_p7 = pnand %p4420_p6, %p4417_p5 }
 0x34f   :  { %4425 = shalt.err (!%p4422_p7)
}
 0x350   :  { %3306 = dma.vmem_to_hbm [thread:$0]  %s3304_s20, 32, %s5828_s5, [#allocation3]  }
 0x351   :  { %4426 = dma.done.wait [#allocation3], 32  }
 0x352   :  { %4427 = vsyncadd [#allocation3], 4294967264 }
 0x353   :  { %3310 = vsyncpa [#allocation3], 1 }

</bundles_post_ra>
